<compile_context>
chip_gen: v7x
topology: tpu7x:2x2x1
jax: 0.10.0
libtpu: 0.0.40
codegen_flags: <defaults>
</compile_context>

<pallas_src>
import functools
import math

import jax
import jax.numpy as jnp
from jax import lax
from jax.experimental import pallas as pl
from jax.experimental.pallas import tpu as pltpu


# --------------------------- fused Pallas kernel ----------------------------

def _bilstm_fused_kernel(T, B, H, n_layers, *refs):
    """Embedding gather + n_layers of bidirectional LSTM + linear head.

    refs (inputs then output):
      ids_ref   : (T*B, 1) int32   time-major token ids (padded rows -> 0)
      lens_ref  : (B, 1)   int32   sequence lengths (0 for padded batch rows)
      embed_ref : (Vp, E)  f32     vocab-padded embedding table
      per layer l:
        wih_ref : (F, 8H)  bf16    input weights, gate-type-major columns
        whh_ref : (2H, 8H) bf16    block-diag recurrent weights, same columns
        b_ref   : (1, 8H)  f32     b_ih + b_hh, same column order
      fcw_ref   : (2H, C)  f32     linear head
      fcb_ref   : (1, C)   f32
      out_ref   : (B, C)   f32     logits
    """
    ids_ref, lens_ref, embed_ref = refs[0], refs[1], refs[2]
    layer_refs = refs[3:3 + 3 * n_layers]
    fcw_ref, fcb_ref, out_ref = refs[3 + 3 * n_layers:]

    twoH, eightH = 2 * H, 8 * H
    lens = lens_ref[...]                                         # (B, 1) int32

    # Hoisted lane patterns (computed once, reused every step / layer).
    lane2h = lax.broadcasted_iota(jnp.int32, (B, twoH), 1) < H   # fwd half of state
    col8h = lax.broadcasted_iota(jnp.int32, (1, eightH), 1)
    fwd_cols = (col8h % twoH) < H                                # fwd cols of gates
    lane2h_i = lane2h.astype(jnp.int32)
    # Per-step validity masks (packed-sequence hold), same for every layer:
    # fwd half compares against t = s, bwd half against t = T-1-s.
    mvalids = [(lane2h_i * s + (1 - lane2h_i) * (T - 1 - s)) < lens
               for s in range(T)]                                # list of (B, 2H) bool

    # ---- embedding gather as an exact one-hot f32 MXU matmul (VMEM vocab).
    # TODO(synk): VMEM-resident embedding only works for small/demo vocabs;
    # large vocabs need a DMA gather from HBM instead.
    Vp = embed_ref.shape[0]
    vocab_iota = lax.broadcasted_iota(jnp.int32, (T * B, Vp), 1)
    onehot = (vocab_iota == ids_ref[...]).astype(jnp.float32)    # (T*B, Vp)
    x = jnp.dot(onehot, embed_ref[...],
                preferred_element_type=jnp.float32).astype(jnp.bfloat16)  # (T*B, E)

    def run_layer(x_in, wih, whh, bias):
        # Hoisted input projection for BOTH directions + folded bias: one big
        # MXU matmul with M = T*B; only h @ Whh stays on the serial chain.
        proj = jnp.dot(x_in, wih, preferred_element_type=jnp.float32) + bias  # (T*B, 8H)
        hcat = jnp.zeros((B, twoH), jnp.float32)     # [h_fwd | h_bwd]
        ccat = jnp.zeros((B, twoH), jnp.float32)
        hs = []
        # Fully unrolled serial recurrence (T small & static); one fused
        # block-diagonal matmul per step drives both directions.
        # TODO(synk): for large T switch to lax.fori_loop(..., unroll=k).
        # TODO(synk): on v7x the two directions could be split across the two
        # TensorCores; at this toy size the barrier would dominate.
        for s in range(T):
            rf = slice(s * B, (s + 1) * B)                 # fwd reads time s
            rb = slice((T - 1 - s) * B, (T - s) * B)       # bwd reads time T-1-s
            proj_s = jnp.where(fwd_cols, proj[rf], proj[rb])           # (B, 8H)
            gates = proj_s + jnp.dot(hcat.astype(jnp.bfloat16), whh,
                                     preferred_element_type=jnp.float32)
            sig = jax.nn.sigmoid(gates)    # whole-vreg EUP passes,
            tnh = jnp.tanh(gates)          # then 2H(=64)-lane slices
            i = sig[:, 0 * twoH:1 * twoH]
            f = sig[:, 1 * twoH:2 * twoH]
            g = tnh[:, 2 * twoH:3 * twoH]
            o = sig[:, 3 * twoH:4 * twoH]
            c_new = f * ccat + i * g
            h_new = o * jnp.tanh(c_new)
            # packed-sequence semantics: hold state on padded steps.
            hcat = jnp.where(mvalids[s], h_new, hcat)
            ccat = jnp.where(mvalids[s], c_new, ccat)
            hs.append(hcat)
        return hs, hcat

    hcat = None
    for li in range(n_layers):
        wih = layer_refs[3 * li][...]
        whh = layer_refs[3 * li + 1][...]
        bias = layer_refs[3 * li + 2][...]
        hs, hcat = run_layer(x, wih, whh, bias)
        if li + 1 < n_layers:
            # Next layer's input at time t = [h_fwd(t) | h_bwd(t)]; the bwd
            # half lives in the step-(T-1-t) state.  Assembled with lane
            # selects on VMEM-resident values only (no HBM, no narrow stores).
            rows = [jnp.where(lane2h, hs[t], hs[T - 1 - t]) for t in range(T)]
            x = jnp.concatenate(rows, axis=0).astype(jnp.bfloat16)     # (T*B, 2H)
        # TODO(synk): nn.LSTM inter-layer dropout omitted (eval-mode identity).

    # Linear head fused in: hcat == [fwd_last | bwd_last] == cat(last_h[-2], last_h[-1]).
    # TODO(synk): nn.Dropout in the head omitted (eval-mode identity).
    out_ref[...] = (jnp.dot(hcat, fcw_ref[...],
                            preferred_element_type=jnp.float32) + fcb_ref[...])


# ------------------------------ wrappers ------------------------------------

def bilstm_forward(packed, x_ids, lengths):
    """x_ids: (B, T) int32 token ids, lengths: (B,) int32. Returns (B, C) logits."""
    B, T = x_ids.shape
    n_layers = len(packed["layers"])
    H = packed["layers"][0][1].shape[0] // 2         # whh_cat is (2H, 8H)
    C = packed["fc_w"].shape[1]

    # Pad batch to 8 sublanes; padded rows get id 0 and length 0 (fully masked).
    Bp = ((B + 7) // 8) * 8
    ids_tm = jnp.transpose(x_ids, (1, 0)).astype(jnp.int32)        # (T, B)
    lens = lengths.astype(jnp.int32)
    if Bp != B:
        ids_tm = jnp.pad(ids_tm, ((0, 0), (0, Bp - B)))
        lens = jnp.pad(lens, (0, Bp - B))
    ids_col = ids_tm.reshape(T * Bp, 1)                            # (T*Bp, 1) int32
    lens_col = lens.reshape(Bp, 1)                                 # (Bp, 1)   int32

    operands = [ids_col, lens_col, packed["embed"]]
    for (wih, whh, b) in packed["layers"]:
        operands += [wih, whh, b]
    operands += [packed["fc_w"], packed["fc_b"]]

    in_specs = [pl.BlockSpec(op.shape, lambda i: (0, 0)) for op in operands]
    kernel = functools.partial(_bilstm_fused_kernel, T, Bp, H, n_layers)

    logits = pl.pallas_call(
        kernel,
        out_shape=jax.ShapeDtypeStruct((Bp, C), jnp.float32),
        grid=(1,),
        in_specs=in_specs,
        out_specs=pl.BlockSpec((Bp, C), lambda i: (0, 0)),
        compiler_params=pltpu.CompilerParams(
            dimension_semantics=("arbitrary",)),
    )(*operands)
    return logits[:B]


# ----------------------- one-time weight pre-packing ------------------------

def _interleave_gate_cols(m_f, m_b, H):
    # [i,f,g,o] per direction -> gate-type-major [i_f i_b | f_f f_b | g_f g_b | o_f o_b]
    parts = []
    for g in range(4):
        parts.append(m_f[:, g * H:(g + 1) * H])
        parts.append(m_b[:, g * H:(g + 1) * H])
    return jnp.concatenate(parts, axis=1)


def pack_params(params):
    """Done ONCE outside the jitted forward: vocab padding, gate-type-major
    column interleave, block-diagonal recurrent weights, folded biases,
    bf16 casts for MXU operands."""
    embed = params["embed"]
    V, _ = embed.shape
    Vp = ((V + 127) // 128) * 128
    packed = {"embed": jnp.pad(embed, ((0, Vp - V), (0, 0)))}      # f32

    layers = []
    for (wih_f, whh_f, b_f, wih_b, whh_b, b_b) in params["lstm"]:
        H = whh_f.shape[0]
        wih = _interleave_gate_cols(wih_f, wih_b, H).astype(jnp.bfloat16)   # (F, 8H)
        z = jnp.zeros_like(whh_f)
        whh = _interleave_gate_cols(jnp.concatenate([whh_f, z], axis=0),
                                    jnp.concatenate([z, whh_b], axis=0),
                                    H).astype(jnp.bfloat16)                 # (2H, 8H) block-diag
        bias = _interleave_gate_cols(b_f, b_b, H)                           # (1, 8H) f32
        layers.append((wih, whh, bias))
    packed["layers"] = layers
    packed["fc_w"] = params["fc_w"]
    packed["fc_b"] = params["fc_b"]
    return packed


# ----------------------- deterministic parameter init -----------------------

def init_params(key, vocab, embed_dim, hidden_dim, num_layers, num_classes):
    keys = iter(jax.random.split(key, 4 + num_layers * 12))
    params = {}
    val_range = 0.5 / embed_dim
    params["embed"] = jax.random.uniform(
        next(keys), (vocab, embed_dim), jnp.float32, -val_range, val_range)

    k = 1.0 / math.sqrt(hidden_dim)
    layers = []
    for layer in range(num_layers):
        in_dim = embed_dim if layer == 0 else 2 * hidden_dim
        per_dir = []
        for _ in range(2):  # fwd, bwd
            w_ih = jax.random.uniform(next(keys), (in_dim, 4 * hidden_dim),
                                      jnp.float32, -k, k)
            w_hh = jax.random.uniform(next(keys), (hidden_dim, 4 * hidden_dim),
                                      jnp.float32, -k, k)
            b_ih = jax.random.uniform(next(keys), (4 * hidden_dim,),
                                      jnp.float32, -k, k)
            b_hh = jax.random.uniform(next(keys), (4 * hidden_dim,),
                                      jnp.float32, -k, k)
            per_dir += [w_ih, w_hh, (b_ih + b_hh).reshape(1, 4 * hidden_dim)]
        layers.append(tuple(per_dir))
    params["lstm"] = layers

    kf = 1.0 / math.sqrt(2 * hidden_dim)
    params["fc_w"] = jax.random.uniform(next(keys), (2 * hidden_dim, num_classes),
                                        jnp.float32, -kf, kf)
    params["fc_b"] = jax.random.uniform(next(keys), (1, num_classes),
                                        jnp.float32, -kf, kf)
    return params


# --------------------------- pure-JAX reference ------------------------------

def _lstm_ref(x, mask, w_ih, w_hh, b):
    T, B, _ = x.shape
    H = w_hh.shape[0]
    h = jnp.zeros((B, H), jnp.float32)
    c = jnp.zeros((B, H), jnp.float32)
    hs = []
    for t in range(T):
        gates = x[t] @ w_ih + h @ w_hh + b
        i = jax.nn.sigmoid(gates[:, :H]); f = jax.nn.sigmoid(gates[:, H:2 * H])
        g = jnp.tanh(gates[:, 2 * H:3 * H]); o = jax.nn.sigmoid(gates[:, 3 * H:4 * H])
        c_new = f * c + i * g
        h_new = o * jnp.tanh(c_new)
        m = mask[t]
        h = m * h_new + (1.0 - m) * h
        c = m * c_new + (1.0 - m) * c
        hs.append(h)
    return jnp.stack(hs), h


def bilstm_forward_ref(params, x_ids, lengths):
    emb = jnp.take(params["embed"], x_ids, axis=0)
    B, T, _ = emb.shape
    x = jnp.transpose(emb, (1, 0, 2)).astype(jnp.float32)
    mask = (jnp.arange(T)[:, None] < lengths[None, :]).astype(jnp.float32)[:, :, None]
    layer_in = x
    for (wih_f, whh_f, b_f, wih_b, whh_b, b_b) in params["lstm"]:
        hseq_f, h_f = _lstm_ref(layer_in, mask, wih_f, whh_f, b_f)
        hseq_b_rev, h_b = _lstm_ref(layer_in[::-1], mask[::-1], wih_b, whh_b, b_b)
        layer_in = jnp.concatenate([hseq_f, hseq_b_rev[::-1]], axis=-1)
    feat = jnp.concatenate([h_f, h_b], axis=-1)
    return feat @ params["fc_w"] + params["fc_b"]


# ---------------------------------- main -------------------------------------

if __name__ == "__main__":
    VOCAB, EMBED, HIDDEN = 50, 32, 32
    NUM_LAYERS, NUM_CLASSES = 2, 4
    B, T = 2, 8

    key = jax.random.PRNGKey(0)
    k_params, k_ids = jax.random.split(key)
    params = init_params(k_params, VOCAB, EMBED, HIDDEN, NUM_LAYERS, NUM_CLASSES)
    packed = pack_params(params)              # one-time packing, outside jit

    x_ids = jax.random.randint(k_ids, (B, T), 0, VOCAB, dtype=jnp.int32)
    lengths = jnp.array([8, 5], dtype=jnp.int32)   # variable-length batch

    fwd = jax.jit(bilstm_forward)
    out = jax.block_until_ready(fwd(packed, x_ids, lengths))

    ref = bilstm_forward_ref(params, x_ids, lengths)
    assert out.shape == (B, NUM_CLASSES)
    assert bool(jnp.all(jnp.isfinite(out)))
    # bf16 MXU operands (f32 accumulation / state) -> slightly loosened tolerance.
    assert bool(jnp.allclose(out, ref, atol=2e-2, rtol=2e-2))

    print("KERNEL_OK")
</pallas_src>

<mosaic_0001>
module attributes {stable_mosaic.version = 11 : i64} {
  func.func @_bilstm_fused_kernel(%arg0: i32, %arg1: memref<64x1xi32, #tpu.memory_space<vmem>>, %arg2: memref<8x1xi32, #tpu.memory_space<vmem>>, %arg3: memref<128x32xf32, #tpu.memory_space<vmem>>, %arg4: memref<32x256xbf16, #tpu.memory_space<vmem>>, %arg5: memref<64x256xbf16, #tpu.memory_space<vmem>>, %arg6: memref<1x256xf32, #tpu.memory_space<vmem>>, %arg7: memref<64x256xbf16, #tpu.memory_space<vmem>>, %arg8: memref<64x256xbf16, #tpu.memory_space<vmem>>, %arg9: memref<1x256xf32, #tpu.memory_space<vmem>>, %arg10: memref<64x4xf32, #tpu.memory_space<vmem>>, %arg11: memref<1x4xf32, #tpu.memory_space<vmem>>, %arg12: memref<8x4xf32, #tpu.memory_space<vmem>>) attributes {dimension_semantics = [#tpu.dimension_semantics<arbitrary>], iteration_bounds = array<i64: 1>, scalar_prefetch = 0 : i64, scratch_operands = 0 : i64, tpu.core_type = #tpu.core_type<tc>, window_params = [{pipeline_mode = #tpu.pipeline_mode<synchronous>, transform_indices = @transform_0, window_bounds = array<i64: 64, 1>}, {pipeline_mode = #tpu.pipeline_mode<synchronous>, transform_indices = @transform_1, window_bounds = array<i64: 8, 1>}, {pipeline_mode = #tpu.pipeline_mode<synchronous>, transform_indices = @transform_2, window_bounds = array<i64: 128, 32>}, {pipeline_mode = #tpu.pipeline_mode<synchronous>, transform_indices = @transform_3, window_bounds = array<i64: 32, 256>}, {pipeline_mode = #tpu.pipeline_mode<synchronous>, transform_indices = @transform_4, window_bounds = array<i64: 64, 256>}, {pipeline_mode = #tpu.pipeline_mode<synchronous>, transform_indices = @transform_5, window_bounds = array<i64: 1, 256>}, {pipeline_mode = #tpu.pipeline_mode<synchronous>, transform_indices = @transform_6, window_bounds = array<i64: 64, 256>}, {pipeline_mode = #tpu.pipeline_mode<synchronous>, transform_indices = @transform_7, window_bounds = array<i64: 64, 256>}, {pipeline_mode = #tpu.pipeline_mode<synchronous>, transform_indices = @transform_8, window_bounds = array<i64: 1, 256>}, {pipeline_mode = #tpu.pipeline_mode<synchronous>, transform_indices = @transform_9, window_bounds = array<i64: 64, 4>}, {pipeline_mode = #tpu.pipeline_mode<synchronous>, transform_indices = @transform_10, window_bounds = array<i64: 1, 4>}, {pipeline_mode = #tpu.pipeline_mode<synchronous>, transform_indices = @transform_11, window_bounds = array<i64: 8, 4>}]} {
    %c0 = arith.constant 0 : index
    %c0_0 = arith.constant 0 : index
    %0 = vector.load %arg2[%c0, %c0_0] : memref<8x1xi32, #tpu.memory_space<vmem>>, vector<8x1xi32>
    %1 = tpu.iota {dimensions = array<i32: 1>} : vector<8x64xi32>
    %c32_i32 = arith.constant 32 : i32
    %2 = vector.broadcast %c32_i32 : i32 to vector<8x64xi32>
    %3 = arith.cmpi slt, %1, %2 : vector<8x64xi32>
    %4 = tpu.iota {dimensions = array<i32: 1>} : vector<1x256xi32>
    %c64_i32 = arith.constant 64 : i32
    %c0_i32 = arith.constant 0 : i32
    %5 = arith.cmpi eq, %c64_i32, %c0_i32 : i32
    %c1_i32 = arith.constant 1 : i32
    %6 = arith.select %5, %c1_i32, %c64_i32 : i32
    %7 = vector.broadcast %6 : i32 to vector<1x256xi32>
    %8 = arith.remsi %4, %7 : vector<1x256xi32>
    %c0_i32_1 = arith.constant 0 : i32
    %9 = vector.broadcast %c0_i32_1 : i32 to vector<1x256xi32>
    %10 = arith.cmpi ne, %8, %9 : vector<1x256xi32>
    %c0_i32_2 = arith.constant 0 : i32
    %11 = vector.broadcast %c0_i32_2 : i32 to vector<1x256xi32>
    %12 = arith.cmpi slt, %8, %11 : vector<1x256xi32>
    %c0_i32_3 = arith.constant 0 : i32
    %13 = arith.cmpi slt, %6, %c0_i32_3 : i32
    %14 = vector.broadcast %13 : i1 to vector<1x256xi1>
    %15 = vector.broadcast %14 : vector<1x256xi1> to vector<1x256xi1>
    %16 = arith.xori %12, %15 : vector<1x256xi1>
    %17 = arith.andi %16, %10 : vector<1x256xi1>
    %18 = vector.broadcast %6 : i32 to vector<1x256xi32>
    %19 = arith.addi %8, %18 : vector<1x256xi32>
    %20 = arith.select %17, %19, %8 : vector<1x256xi1>, vector<1x256xi32>
    %c32_i32_4 = arith.constant 32 : i32
    %21 = vector.broadcast %c32_i32_4 : i32 to vector<1x256xi32>
    %22 = arith.cmpi slt, %20, %21 : vector<1x256xi32>
    %23 = arith.extui %3 : vector<8x64xi1> to vector<8x64xi32>
    %c0_i32_5 = arith.constant 0 : i32
    %24 = vector.broadcast %c0_i32_5 : i32 to vector<8x64xi32>
    %25 = arith.muli %23, %24 : vector<8x64xi32>
    %c1_i32_6 = arith.constant 1 : i32
    %26 = vector.broadcast %c1_i32_6 : i32 to vector<8x64xi32>
    %27 = arith.subi %26, %23 : vector<8x64xi32>
    %c7_i32 = arith.constant 7 : i32
    %28 = vector.broadcast %c7_i32 : i32 to vector<8x64xi32>
    %29 = arith.muli %27, %28 : vector<8x64xi32>
    %30 = arith.addi %25, %29 : vector<8x64xi32>
    %31 = vector.broadcast %0 : vector<8x1xi32> to vector<8x64xi32>
    %32 = arith.cmpi slt, %30, %31 : vector<8x64xi32>
    %c1_i32_7 = arith.constant 1 : i32
    %33 = vector.broadcast %c1_i32_7 : i32 to vector<8x64xi32>
    %34 = arith.muli %23, %33 : vector<8x64xi32>
    %c1_i32_8 = arith.constant 1 : i32
    %35 = vector.broadcast %c1_i32_8 : i32 to vector<8x64xi32>
    %36 = arith.subi %35, %23 : vector<8x64xi32>
    %c6_i32 = arith.constant 6 : i32
    %37 = vector.broadcast %c6_i32 : i32 to vector<8x64xi32>
    %38 = arith.muli %36, %37 : vector<8x64xi32>
    %39 = arith.addi %34, %38 : vector<8x64xi32>
    %40 = vector.broadcast %0 : vector<8x1xi32> to vector<8x64xi32>
    %41 = arith.cmpi slt, %39, %40 : vector<8x64xi32>
    %c2_i32 = arith.constant 2 : i32
    %42 = vector.broadcast %c2_i32 : i32 to vector<8x64xi32>
    %43 = arith.muli %23, %42 : vector<8x64xi32>
    %c1_i32_9 = arith.constant 1 : i32
    %44 = vector.broadcast %c1_i32_9 : i32 to vector<8x64xi32>
    %45 = arith.subi %44, %23 : vector<8x64xi32>
    %c5_i32 = arith.constant 5 : i32
    %46 = vector.broadcast %c5_i32 : i32 to vector<8x64xi32>
    %47 = arith.muli %45, %46 : vector<8x64xi32>
    %48 = arith.addi %43, %47 : vector<8x64xi32>
    %49 = vector.broadcast %0 : vector<8x1xi32> to vector<8x64xi32>
    %50 = arith.cmpi slt, %48, %49 : vector<8x64xi32>
    %c3_i32 = arith.constant 3 : i32
    %51 = vector.broadcast %c3_i32 : i32 to vector<8x64xi32>
    %52 = arith.muli %23, %51 : vector<8x64xi32>
    %c1_i32_10 = arith.constant 1 : i32
    %53 = vector.broadcast %c1_i32_10 : i32 to vector<8x64xi32>
    %54 = arith.subi %53, %23 : vector<8x64xi32>
    %c4_i32 = arith.constant 4 : i32
    %55 = vector.broadcast %c4_i32 : i32 to vector<8x64xi32>
    %56 = arith.muli %54, %55 : vector<8x64xi32>
    %57 = arith.addi %52, %56 : vector<8x64xi32>
    %58 = vector.broadcast %0 : vector<8x1xi32> to vector<8x64xi32>
    %59 = arith.cmpi slt, %57, %58 : vector<8x64xi32>
    %c4_i32_11 = arith.constant 4 : i32
    %60 = vector.broadcast %c4_i32_11 : i32 to vector<8x64xi32>
    %61 = arith.muli %23, %60 : vector<8x64xi32>
    %c1_i32_12 = arith.constant 1 : i32
    %62 = vector.broadcast %c1_i32_12 : i32 to vector<8x64xi32>
    %63 = arith.subi %62, %23 : vector<8x64xi32>
    %c3_i32_13 = arith.constant 3 : i32
    %64 = vector.broadcast %c3_i32_13 : i32 to vector<8x64xi32>
    %65 = arith.muli %63, %64 : vector<8x64xi32>
    %66 = arith.addi %61, %65 : vector<8x64xi32>
    %67 = vector.broadcast %0 : vector<8x1xi32> to vector<8x64xi32>
    %68 = arith.cmpi slt, %66, %67 : vector<8x64xi32>
    %c5_i32_14 = arith.constant 5 : i32
    %69 = vector.broadcast %c5_i32_14 : i32 to vector<8x64xi32>
    %70 = arith.muli %23, %69 : vector<8x64xi32>
    %c1_i32_15 = arith.constant 1 : i32
    %71 = vector.broadcast %c1_i32_15 : i32 to vector<8x64xi32>
    %72 = arith.subi %71, %23 : vector<8x64xi32>
    %c2_i32_16 = arith.constant 2 : i32
    %73 = vector.broadcast %c2_i32_16 : i32 to vector<8x64xi32>
    %74 = arith.muli %72, %73 : vector<8x64xi32>
    %75 = arith.addi %70, %74 : vector<8x64xi32>
    %76 = vector.broadcast %0 : vector<8x1xi32> to vector<8x64xi32>
    %77 = arith.cmpi slt, %75, %76 : vector<8x64xi32>
    %c6_i32_17 = arith.constant 6 : i32
    %78 = vector.broadcast %c6_i32_17 : i32 to vector<8x64xi32>
    %79 = arith.muli %23, %78 : vector<8x64xi32>
    %c1_i32_18 = arith.constant 1 : i32
    %80 = vector.broadcast %c1_i32_18 : i32 to vector<8x64xi32>
    %81 = arith.subi %80, %23 : vector<8x64xi32>
    %c1_i32_19 = arith.constant 1 : i32
    %82 = vector.broadcast %c1_i32_19 : i32 to vector<8x64xi32>
    %83 = arith.muli %81, %82 : vector<8x64xi32>
    %84 = arith.addi %79, %83 : vector<8x64xi32>
    %85 = vector.broadcast %0 : vector<8x1xi32> to vector<8x64xi32>
    %86 = arith.cmpi slt, %84, %85 : vector<8x64xi32>
    %c7_i32_20 = arith.constant 7 : i32
    %87 = vector.broadcast %c7_i32_20 : i32 to vector<8x64xi32>
    %88 = arith.muli %23, %87 : vector<8x64xi32>
    %c1_i32_21 = arith.constant 1 : i32
    %89 = vector.broadcast %c1_i32_21 : i32 to vector<8x64xi32>
    %90 = arith.subi %89, %23 : vector<8x64xi32>
    %c0_i32_22 = arith.constant 0 : i32
    %91 = vector.broadcast %c0_i32_22 : i32 to vector<8x64xi32>
    %92 = arith.muli %90, %91 : vector<8x64xi32>
    %93 = arith.addi %88, %92 : vector<8x64xi32>
    %94 = vector.broadcast %0 : vector<8x1xi32> to vector<8x64xi32>
    %95 = arith.cmpi slt, %93, %94 : vector<8x64xi32>
    %96 = tpu.iota {dimensions = array<i32: 1>} : vector<64x128xi32>
    %c0_23 = arith.constant 0 : index
    %c0_24 = arith.constant 0 : index
    %97 = vector.load %arg1[%c0_23, %c0_24] : memref<64x1xi32, #tpu.memory_space<vmem>>, vector<64x1xi32>
    %98 = vector.broadcast %97 : vector<64x1xi32> to vector<64x128xi32>
    %99 = arith.cmpi eq, %96, %98 : vector<64x128xi32>
    %100 = arith.extui %99 : vector<64x128xi1> to vector<64x128xi32>
    %101 = arith.sitofp %100 : vector<64x128xi32> to vector<64x128xf32>
    %c0_25 = arith.constant 0 : index
    %c0_26 = arith.constant 0 : index
    %102 = vector.load %arg3[%c0_25, %c0_26] : memref<128x32xf32, #tpu.memory_space<vmem>>, vector<128x32xf32>
    %cst = arith.constant dense<0.000000e+00> : vector<64x32xf32>
    %103 = tpu.matmul %101, %102, %cst {dimension_numbers = #tpu.dot_dimension_numbers<[1], [0], [0], [1], [0, 0, 1, 1], [], []>} : vector<64x128xf32>, vector<128x32xf32>, vector<64x32xf32> -> vector<64x32xf32>
    %104 = arith.truncf %103 : vector<64x32xf32> to vector<64x32xbf16>
    %c0_27 = arith.constant 0 : index
    %c0_28 = arith.constant 0 : index
    %105 = vector.load %arg4[%c0_27, %c0_28] : memref<32x256xbf16, #tpu.memory_space<vmem>>, vector<32x256xbf16>
    %c0_29 = arith.constant 0 : index
    %c0_30 = arith.constant 0 : index
    %106 = vector.load %arg5[%c0_29, %c0_30] : memref<64x256xbf16, #tpu.memory_space<vmem>>, vector<64x256xbf16>
    %c0_31 = arith.constant 0 : index
    %c0_32 = arith.constant 0 : index
    %107 = vector.load %arg6[%c0_31, %c0_32] : memref<1x256xf32, #tpu.memory_space<vmem>>, vector<1x256xf32>
    %cst_33 = arith.constant dense<0.000000e+00> : vector<64x256xf32>
    %108 = tpu.matmul %104, %105, %cst_33 {dimension_numbers = #tpu.dot_dimension_numbers<[1], [0], [0], [1], [0, 0, 1, 1], [], []>} : vector<64x32xbf16>, vector<32x256xbf16>, vector<64x256xf32> -> vector<64x256xf32>
    %109 = vector.broadcast %107 : vector<1x256xf32> to vector<64x256xf32>
    %110 = arith.addf %108, %109 : vector<64x256xf32>
    %cst_34 = arith.constant 0.000000e+00 : f32
    %111 = vector.broadcast %cst_34 : f32 to vector<8x64xf32>
    %cst_35 = arith.constant 0.000000e+00 : f32
    %112 = vector.broadcast %cst_35 : f32 to vector<8x64xf32>
    %113 = vector.extract_strided_slice %110 {offsets = [0, 0], sizes = [8, 256], strides = [1, 1]} : vector<64x256xf32> to vector<8x256xf32>
    %114 = vector.extract_strided_slice %110 {offsets = [56, 0], sizes = [8, 256], strides = [1, 1]} : vector<64x256xf32> to vector<8x256xf32>
    %115 = vector.shape_cast %22 : vector<1x256xi1> to vector<1x256xi1>
    %116 = vector.broadcast %115 : vector<1x256xi1> to vector<8x256xi1>
    %117 = arith.select %116, %113, %114 : vector<8x256xi1>, vector<8x256xf32>
    %118 = arith.truncf %111 : vector<8x64xf32> to vector<8x64xbf16>
    %cst_36 = arith.constant dense<0.000000e+00> : vector<8x256xf32>
    %119 = tpu.matmul %118, %106, %cst_36 {dimension_numbers = #tpu.dot_dimension_numbers<[1], [0], [0], [1], [0, 0, 1, 1], [], []>} : vector<8x64xbf16>, vector<64x256xbf16>, vector<8x256xf32> -> vector<8x256xf32>
    %120 = arith.addf %117, %119 : vector<8x256xf32>
    %121 = arith.negf %120 : vector<8x256xf32>
    %122 = math.exp %121 : vector<8x256xf32>
    %cst_37 = arith.constant 1.000000e+00 : f32
    %123 = vector.broadcast %cst_37 : f32 to vector<8x256xf32>
    %124 = arith.addf %123, %122 : vector<8x256xf32>
    %125 = arith.divf %123, %124 : vector<8x256xf32>
    %126 = math.tanh %120 : vector<8x256xf32>
    %127 = vector.extract_strided_slice %125 {offsets = [0, 0], sizes = [8, 64], strides = [1, 1]} : vector<8x256xf32> to vector<8x64xf32>
    %128 = vector.extract_strided_slice %125 {offsets = [0, 64], sizes = [8, 64], strides = [1, 1]} : vector<8x256xf32> to vector<8x64xf32>
    %129 = vector.extract_strided_slice %126 {offsets = [0, 128], sizes = [8, 64], strides = [1, 1]} : vector<8x256xf32> to vector<8x64xf32>
    %130 = vector.extract_strided_slice %125 {offsets = [0, 192], sizes = [8, 64], strides = [1, 1]} : vector<8x256xf32> to vector<8x64xf32>
    %131 = arith.mulf %128, %112 : vector<8x64xf32>
    %132 = arith.mulf %127, %129 : vector<8x64xf32>
    %133 = arith.addf %131, %132 : vector<8x64xf32>
    %134 = math.tanh %133 : vector<8x64xf32>
    %135 = arith.mulf %130, %134 : vector<8x64xf32>
    %136 = arith.select %32, %135, %111 : vector<8x64xi1>, vector<8x64xf32>
    %137 = arith.select %32, %133, %112 : vector<8x64xi1>, vector<8x64xf32>
    %138 = vector.extract_strided_slice %110 {offsets = [8, 0], sizes = [8, 256], strides = [1, 1]} : vector<64x256xf32> to vector<8x256xf32>
    %139 = vector.extract_strided_slice %110 {offsets = [48, 0], sizes = [8, 256], strides = [1, 1]} : vector<64x256xf32> to vector<8x256xf32>
    %140 = vector.shape_cast %22 : vector<1x256xi1> to vector<1x256xi1>
    %141 = vector.broadcast %140 : vector<1x256xi1> to vector<8x256xi1>
    %142 = arith.select %141, %138, %139 : vector<8x256xi1>, vector<8x256xf32>
    %143 = arith.truncf %136 : vector<8x64xf32> to vector<8x64xbf16>
    %cst_38 = arith.constant dense<0.000000e+00> : vector<8x256xf32>
    %144 = tpu.matmul %143, %106, %cst_38 {dimension_numbers = #tpu.dot_dimension_numbers<[1], [0], [0], [1], [0, 0, 1, 1], [], []>} : vector<8x64xbf16>, vector<64x256xbf16>, vector<8x256xf32> -> vector<8x256xf32>
    %145 = arith.addf %142, %144 : vector<8x256xf32>
    %146 = arith.negf %145 : vector<8x256xf32>
    %147 = math.exp %146 : vector<8x256xf32>
    %cst_39 = arith.constant 1.000000e+00 : f32
    %148 = vector.broadcast %cst_39 : f32 to vector<8x256xf32>
    %149 = arith.addf %148, %147 : vector<8x256xf32>
    %150 = arith.divf %148, %149 : vector<8x256xf32>
    %151 = math.tanh %145 : vector<8x256xf32>
    %152 = vector.extract_strided_slice %150 {offsets = [0, 0], sizes = [8, 64], strides = [1, 1]} : vector<8x256xf32> to vector<8x64xf32>
    %153 = vector.extract_strided_slice %150 {offsets = [0, 64], sizes = [8, 64], strides = [1, 1]} : vector<8x256xf32> to vector<8x64xf32>
    %154 = vector.extract_strided_slice %151 {offsets = [0, 128], sizes = [8, 64], strides = [1, 1]} : vector<8x256xf32> to vector<8x64xf32>
    %155 = vector.extract_strided_slice %150 {offsets = [0, 192], sizes = [8, 64], strides = [1, 1]} : vector<8x256xf32> to vector<8x64xf32>
    %156 = arith.mulf %153, %137 : vector<8x64xf32>
    %157 = arith.mulf %152, %154 : vector<8x64xf32>
    %158 = arith.addf %156, %157 : vector<8x64xf32>
    %159 = math.tanh %158 : vector<8x64xf32>
    %160 = arith.mulf %155, %159 : vector<8x64xf32>
    %161 = arith.select %41, %160, %136 : vector<8x64xi1>, vector<8x64xf32>
    %162 = arith.select %41, %158, %137 : vector<8x64xi1>, vector<8x64xf32>
    %163 = vector.extract_strided_slice %110 {offsets = [16, 0], sizes = [8, 256], strides = [1, 1]} : vector<64x256xf32> to vector<8x256xf32>
    %164 = vector.extract_strided_slice %110 {offsets = [40, 0], sizes = [8, 256], strides = [1, 1]} : vector<64x256xf32> to vector<8x256xf32>
    %165 = vector.shape_cast %22 : vector<1x256xi1> to vector<1x256xi1>
    %166 = vector.broadcast %165 : vector<1x256xi1> to vector<8x256xi1>
    %167 = arith.select %166, %163, %164 : vector<8x256xi1>, vector<8x256xf32>
    %168 = arith.truncf %161 : vector<8x64xf32> to vector<8x64xbf16>
    %cst_40 = arith.constant dense<0.000000e+00> : vector<8x256xf32>
    %169 = tpu.matmul %168, %106, %cst_40 {dimension_numbers = #tpu.dot_dimension_numbers<[1], [0], [0], [1], [0, 0, 1, 1], [], []>} : vector<8x64xbf16>, vector<64x256xbf16>, vector<8x256xf32> -> vector<8x256xf32>
    %170 = arith.addf %167, %169 : vector<8x256xf32>
    %171 = arith.negf %170 : vector<8x256xf32>
    %172 = math.exp %171 : vector<8x256xf32>
    %cst_41 = arith.constant 1.000000e+00 : f32
    %173 = vector.broadcast %cst_41 : f32 to vector<8x256xf32>
    %174 = arith.addf %173, %172 : vector<8x256xf32>
    %175 = arith.divf %173, %174 : vector<8x256xf32>
    %176 = math.tanh %170 : vector<8x256xf32>
    %177 = vector.extract_strided_slice %175 {offsets = [0, 0], sizes = [8, 64], strides = [1, 1]} : vector<8x256xf32> to vector<8x64xf32>
    %178 = vector.extract_strided_slice %175 {offsets = [0, 64], sizes = [8, 64], strides = [1, 1]} : vector<8x256xf32> to vector<8x64xf32>
    %179 = vector.extract_strided_slice %176 {offsets = [0, 128], sizes = [8, 64], strides = [1, 1]} : vector<8x256xf32> to vector<8x64xf32>
    %180 = vector.extract_strided_slice %175 {offsets = [0, 192], sizes = [8, 64], strides = [1, 1]} : vector<8x256xf32> to vector<8x64xf32>
    %181 = arith.mulf %178, %162 : vector<8x64xf32>
    %182 = arith.mulf %177, %179 : vector<8x64xf32>
    %183 = arith.addf %181, %182 : vector<8x64xf32>
    %184 = math.tanh %183 : vector<8x64xf32>
    %185 = arith.mulf %180, %184 : vector<8x64xf32>
    %186 = arith.select %50, %185, %161 : vector<8x64xi1>, vector<8x64xf32>
    %187 = arith.select %50, %183, %162 : vector<8x64xi1>, vector<8x64xf32>
    %188 = vector.extract_strided_slice %110 {offsets = [24, 0], sizes = [8, 256], strides = [1, 1]} : vector<64x256xf32> to vector<8x256xf32>
    %189 = vector.extract_strided_slice %110 {offsets = [32, 0], sizes = [8, 256], strides = [1, 1]} : vector<64x256xf32> to vector<8x256xf32>
    %190 = vector.shape_cast %22 : vector<1x256xi1> to vector<1x256xi1>
    %191 = vector.broadcast %190 : vector<1x256xi1> to vector<8x256xi1>
    %192 = arith.select %191, %188, %189 : vector<8x256xi1>, vector<8x256xf32>
    %193 = arith.truncf %186 : vector<8x64xf32> to vector<8x64xbf16>
    %cst_42 = arith.constant dense<0.000000e+00> : vector<8x256xf32>
    %194 = tpu.matmul %193, %106, %cst_42 {dimension_numbers = #tpu.dot_dimension_numbers<[1], [0], [0], [1], [0, 0, 1, 1], [], []>} : vector<8x64xbf16>, vector<64x256xbf16>, vector<8x256xf32> -> vector<8x256xf32>
    %195 = arith.addf %192, %194 : vector<8x256xf32>
    %196 = arith.negf %195 : vector<8x256xf32>
    %197 = math.exp %196 : vector<8x256xf32>
    %cst_43 = arith.constant 1.000000e+00 : f32
    %198 = vector.broadcast %cst_43 : f32 to vector<8x256xf32>
    %199 = arith.addf %198, %197 : vector<8x256xf32>
    %200 = arith.divf %198, %199 : vector<8x256xf32>
    %201 = math.tanh %195 : vector<8x256xf32>
    %202 = vector.extract_strided_slice %200 {offsets = [0, 0], sizes = [8, 64], strides = [1, 1]} : vector<8x256xf32> to vector<8x64xf32>
    %203 = vector.extract_strided_slice %200 {offsets = [0, 64], sizes = [8, 64], strides = [1, 1]} : vector<8x256xf32> to vector<8x64xf32>
    %204 = vector.extract_strided_slice %201 {offsets = [0, 128], sizes = [8, 64], strides = [1, 1]} : vector<8x256xf32> to vector<8x64xf32>
    %205 = vector.extract_strided_slice %200 {offsets = [0, 192], sizes = [8, 64], strides = [1, 1]} : vector<8x256xf32> to vector<8x64xf32>
    %206 = arith.mulf %203, %187 : vector<8x64xf32>
    %207 = arith.mulf %202, %204 : vector<8x64xf32>
    %208 = arith.addf %206, %207 : vector<8x64xf32>
    %209 = math.tanh %208 : vector<8x64xf32>
    %210 = arith.mulf %205, %209 : vector<8x64xf32>
    %211 = arith.select %59, %210, %186 : vector<8x64xi1>, vector<8x64xf32>
    %212 = arith.select %59, %208, %187 : vector<8x64xi1>, vector<8x64xf32>
    %213 = vector.extract_strided_slice %110 {offsets = [32, 0], sizes = [8, 256], strides = [1, 1]} : vector<64x256xf32> to vector<8x256xf32>
    %214 = vector.extract_strided_slice %110 {offsets = [24, 0], sizes = [8, 256], strides = [1, 1]} : vector<64x256xf32> to vector<8x256xf32>
    %215 = vector.shape_cast %22 : vector<1x256xi1> to vector<1x256xi1>
    %216 = vector.broadcast %215 : vector<1x256xi1> to vector<8x256xi1>
    %217 = arith.select %216, %213, %214 : vector<8x256xi1>, vector<8x256xf32>
    %218 = arith.truncf %211 : vector<8x64xf32> to vector<8x64xbf16>
    %cst_44 = arith.constant dense<0.000000e+00> : vector<8x256xf32>
    %219 = tpu.matmul %218, %106, %cst_44 {dimension_numbers = #tpu.dot_dimension_numbers<[1], [0], [0], [1], [0, 0, 1, 1], [], []>} : vector<8x64xbf16>, vector<64x256xbf16>, vector<8x256xf32> -> vector<8x256xf32>
    %220 = arith.addf %217, %219 : vector<8x256xf32>
    %221 = arith.negf %220 : vector<8x256xf32>
    %222 = math.exp %221 : vector<8x256xf32>
    %cst_45 = arith.constant 1.000000e+00 : f32
    %223 = vector.broadcast %cst_45 : f32 to vector<8x256xf32>
    %224 = arith.addf %223, %222 : vector<8x256xf32>
    %225 = arith.divf %223, %224 : vector<8x256xf32>
    %226 = math.tanh %220 : vector<8x256xf32>
    %227 = vector.extract_strided_slice %225 {offsets = [0, 0], sizes = [8, 64], strides = [1, 1]} : vector<8x256xf32> to vector<8x64xf32>
    %228 = vector.extract_strided_slice %225 {offsets = [0, 64], sizes = [8, 64], strides = [1, 1]} : vector<8x256xf32> to vector<8x64xf32>
    %229 = vector.extract_strided_slice %226 {offsets = [0, 128], sizes = [8, 64], strides = [1, 1]} : vector<8x256xf32> to vector<8x64xf32>
    %230 = vector.extract_strided_slice %225 {offsets = [0, 192], sizes = [8, 64], strides = [1, 1]} : vector<8x256xf32> to vector<8x64xf32>
    %231 = arith.mulf %228, %212 : vector<8x64xf32>
    %232 = arith.mulf %227, %229 : vector<8x64xf32>
    %233 = arith.addf %231, %232 : vector<8x64xf32>
    %234 = math.tanh %233 : vector<8x64xf32>
    %235 = arith.mulf %230, %234 : vector<8x64xf32>
    %236 = arith.select %68, %235, %211 : vector<8x64xi1>, vector<8x64xf32>
    %237 = arith.select %68, %233, %212 : vector<8x64xi1>, vector<8x64xf32>
    %238 = vector.extract_strided_slice %110 {offsets = [40, 0], sizes = [8, 256], strides = [1, 1]} : vector<64x256xf32> to vector<8x256xf32>
    %239 = vector.extract_strided_slice %110 {offsets = [16, 0], sizes = [8, 256], strides = [1, 1]} : vector<64x256xf32> to vector<8x256xf32>
    %240 = vector.shape_cast %22 : vector<1x256xi1> to vector<1x256xi1>
    %241 = vector.broadcast %240 : vector<1x256xi1> to vector<8x256xi1>
    %242 = arith.select %241, %238, %239 : vector<8x256xi1>, vector<8x256xf32>
    %243 = arith.truncf %236 : vector<8x64xf32> to vector<8x64xbf16>
    %cst_46 = arith.constant dense<0.000000e+00> : vector<8x256xf32>
    %244 = tpu.matmul %243, %106, %cst_46 {dimension_numbers = #tpu.dot_dimension_numbers<[1], [0], [0], [1], [0, 0, 1, 1], [], []>} : vector<8x64xbf16>, vector<64x256xbf16>, vector<8x256xf32> -> vector<8x256xf32>
    %245 = arith.addf %242, %244 : vector<8x256xf32>
    %246 = arith.negf %245 : vector<8x256xf32>
    %247 = math.exp %246 : vector<8x256xf32>
    %cst_47 = arith.constant 1.000000e+00 : f32
    %248 = vector.broadcast %cst_47 : f32 to vector<8x256xf32>
    %249 = arith.addf %248, %247 : vector<8x256xf32>
    %250 = arith.divf %248, %249 : vector<8x256xf32>
    %251 = math.tanh %245 : vector<8x256xf32>
    %252 = vector.extract_strided_slice %250 {offsets = [0, 0], sizes = [8, 64], strides = [1, 1]} : vector<8x256xf32> to vector<8x64xf32>
    %253 = vector.extract_strided_slice %250 {offsets = [0, 64], sizes = [8, 64], strides = [1, 1]} : vector<8x256xf32> to vector<8x64xf32>
    %254 = vector.extract_strided_slice %251 {offsets = [0, 128], sizes = [8, 64], strides = [1, 1]} : vector<8x256xf32> to vector<8x64xf32>
    %255 = vector.extract_strided_slice %250 {offsets = [0, 192], sizes = [8, 64], strides = [1, 1]} : vector<8x256xf32> to vector<8x64xf32>
    %256 = arith.mulf %253, %237 : vector<8x64xf32>
    %257 = arith.mulf %252, %254 : vector<8x64xf32>
    %258 = arith.addf %256, %257 : vector<8x64xf32>
    %259 = math.tanh %258 : vector<8x64xf32>
    %260 = arith.mulf %255, %259 : vector<8x64xf32>
    %261 = arith.select %77, %260, %236 : vector<8x64xi1>, vector<8x64xf32>
    %262 = arith.select %77, %258, %237 : vector<8x64xi1>, vector<8x64xf32>
    %263 = vector.extract_strided_slice %110 {offsets = [48, 0], sizes = [8, 256], strides = [1, 1]} : vector<64x256xf32> to vector<8x256xf32>
    %264 = vector.extract_strided_slice %110 {offsets = [8, 0], sizes = [8, 256], strides = [1, 1]} : vector<64x256xf32> to vector<8x256xf32>
    %265 = vector.shape_cast %22 : vector<1x256xi1> to vector<1x256xi1>
    %266 = vector.broadcast %265 : vector<1x256xi1> to vector<8x256xi1>
    %267 = arith.select %266, %263, %264 : vector<8x256xi1>, vector<8x256xf32>
    %268 = arith.truncf %261 : vector<8x64xf32> to vector<8x64xbf16>
    %cst_48 = arith.constant dense<0.000000e+00> : vector<8x256xf32>
    %269 = tpu.matmul %268, %106, %cst_48 {dimension_numbers = #tpu.dot_dimension_numbers<[1], [0], [0], [1], [0, 0, 1, 1], [], []>} : vector<8x64xbf16>, vector<64x256xbf16>, vector<8x256xf32> -> vector<8x256xf32>
    %270 = arith.addf %267, %269 : vector<8x256xf32>
    %271 = arith.negf %270 : vector<8x256xf32>
    %272 = math.exp %271 : vector<8x256xf32>
    %cst_49 = arith.constant 1.000000e+00 : f32
    %273 = vector.broadcast %cst_49 : f32 to vector<8x256xf32>
    %274 = arith.addf %273, %272 : vector<8x256xf32>
    %275 = arith.divf %273, %274 : vector<8x256xf32>
    %276 = math.tanh %270 : vector<8x256xf32>
    %277 = vector.extract_strided_slice %275 {offsets = [0, 0], sizes = [8, 64], strides = [1, 1]} : vector<8x256xf32> to vector<8x64xf32>
    %278 = vector.extract_strided_slice %275 {offsets = [0, 64], sizes = [8, 64], strides = [1, 1]} : vector<8x256xf32> to vector<8x64xf32>
    %279 = vector.extract_strided_slice %276 {offsets = [0, 128], sizes = [8, 64], strides = [1, 1]} : vector<8x256xf32> to vector<8x64xf32>
    %280 = vector.extract_strided_slice %275 {offsets = [0, 192], sizes = [8, 64], strides = [1, 1]} : vector<8x256xf32> to vector<8x64xf32>
    %281 = arith.mulf %278, %262 : vector<8x64xf32>
    %282 = arith.mulf %277, %279 : vector<8x64xf32>
    %283 = arith.addf %281, %282 : vector<8x64xf32>
    %284 = math.tanh %283 : vector<8x64xf32>
    %285 = arith.mulf %280, %284 : vector<8x64xf32>
    %286 = arith.select %86, %285, %261 : vector<8x64xi1>, vector<8x64xf32>
    %287 = arith.select %86, %283, %262 : vector<8x64xi1>, vector<8x64xf32>
    %288 = vector.extract_strided_slice %110 {offsets = [56, 0], sizes = [8, 256], strides = [1, 1]} : vector<64x256xf32> to vector<8x256xf32>
    %289 = vector.extract_strided_slice %110 {offsets = [0, 0], sizes = [8, 256], strides = [1, 1]} : vector<64x256xf32> to vector<8x256xf32>
    %290 = vector.shape_cast %22 : vector<1x256xi1> to vector<1x256xi1>
    %291 = vector.broadcast %290 : vector<1x256xi1> to vector<8x256xi1>
    %292 = arith.select %291, %288, %289 : vector<8x256xi1>, vector<8x256xf32>
    %293 = arith.truncf %286 : vector<8x64xf32> to vector<8x64xbf16>
    %cst_50 = arith.constant dense<0.000000e+00> : vector<8x256xf32>
    %294 = tpu.matmul %293, %106, %cst_50 {dimension_numbers = #tpu.dot_dimension_numbers<[1], [0], [0], [1], [0, 0, 1, 1], [], []>} : vector<8x64xbf16>, vector<64x256xbf16>, vector<8x256xf32> -> vector<8x256xf32>
    %295 = arith.addf %292, %294 : vector<8x256xf32>
    %296 = arith.negf %295 : vector<8x256xf32>
    %297 = math.exp %296 : vector<8x256xf32>
    %cst_51 = arith.constant 1.000000e+00 : f32
    %298 = vector.broadcast %cst_51 : f32 to vector<8x256xf32>
    %299 = arith.addf %298, %297 : vector<8x256xf32>
    %300 = arith.divf %298, %299 : vector<8x256xf32>
    %301 = math.tanh %295 : vector<8x256xf32>
    %302 = vector.extract_strided_slice %300 {offsets = [0, 0], sizes = [8, 64], strides = [1, 1]} : vector<8x256xf32> to vector<8x64xf32>
    %303 = vector.extract_strided_slice %300 {offsets = [0, 64], sizes = [8, 64], strides = [1, 1]} : vector<8x256xf32> to vector<8x64xf32>
    %304 = vector.extract_strided_slice %301 {offsets = [0, 128], sizes = [8, 64], strides = [1, 1]} : vector<8x256xf32> to vector<8x64xf32>
    %305 = vector.extract_strided_slice %300 {offsets = [0, 192], sizes = [8, 64], strides = [1, 1]} : vector<8x256xf32> to vector<8x64xf32>
    %306 = arith.mulf %303, %287 : vector<8x64xf32>
    %307 = arith.mulf %302, %304 : vector<8x64xf32>
    %308 = arith.addf %306, %307 : vector<8x64xf32>
    %309 = math.tanh %308 : vector<8x64xf32>
    %310 = arith.mulf %305, %309 : vector<8x64xf32>
    %311 = arith.select %95, %310, %286 : vector<8x64xi1>, vector<8x64xf32>
    %312 = arith.select %3, %136, %311 : vector<8x64xi1>, vector<8x64xf32>
    %313 = arith.select %3, %161, %286 : vector<8x64xi1>, vector<8x64xf32>
    %314 = arith.select %3, %186, %261 : vector<8x64xi1>, vector<8x64xf32>
    %315 = arith.select %3, %211, %236 : vector<8x64xi1>, vector<8x64xf32>
    %316 = arith.select %3, %236, %211 : vector<8x64xi1>, vector<8x64xf32>
    %317 = arith.select %3, %261, %186 : vector<8x64xi1>, vector<8x64xf32>
    %318 = arith.select %3, %286, %161 : vector<8x64xi1>, vector<8x64xf32>
    %319 = arith.select %3, %311, %136 : vector<8x64xi1>, vector<8x64xf32>
    %320 = tpu.concatenate %312, %313, %314, %315, %316, %317, %318, %319 in 0 : vector<8x64xf32>, vector<8x64xf32>, vector<8x64xf32>, vector<8x64xf32>, vector<8x64xf32>, vector<8x64xf32>, vector<8x64xf32>, vector<8x64xf32> -> vector<64x64xf32>
    %321 = arith.truncf %320 : vector<64x64xf32> to vector<64x64xbf16>
    %c0_52 = arith.constant 0 : index
    %c0_53 = arith.constant 0 : index
    %322 = vector.load %arg7[%c0_52, %c0_53] : memref<64x256xbf16, #tpu.memory_space<vmem>>, vector<64x256xbf16>
    %c0_54 = arith.constant 0 : index
    %c0_55 = arith.constant 0 : index
    %323 = vector.load %arg8[%c0_54, %c0_55] : memref<64x256xbf16, #tpu.memory_space<vmem>>, vector<64x256xbf16>
    %c0_56 = arith.constant 0 : index
    %c0_57 = arith.constant 0 : index
    %324 = vector.load %arg9[%c0_56, %c0_57] : memref<1x256xf32, #tpu.memory_space<vmem>>, vector<1x256xf32>
    %cst_58 = arith.constant dense<0.000000e+00> : vector<64x256xf32>
    %325 = tpu.matmul %321, %322, %cst_58 {dimension_numbers = #tpu.dot_dimension_numbers<[1], [0], [0], [1], [0, 0, 1, 1], [], []>} : vector<64x64xbf16>, vector<64x256xbf16>, vector<64x256xf32> -> vector<64x256xf32>
    %326 = vector.broadcast %324 : vector<1x256xf32> to vector<64x256xf32>
    %327 = arith.addf %325, %326 : vector<64x256xf32>
    %cst_59 = arith.constant 0.000000e+00 : f32
    %328 = vector.broadcast %cst_59 : f32 to vector<8x64xf32>
    %cst_60 = arith.constant 0.000000e+00 : f32
    %329 = vector.broadcast %cst_60 : f32 to vector<8x64xf32>
    %330 = vector.extract_strided_slice %327 {offsets = [0, 0], sizes = [8, 256], strides = [1, 1]} : vector<64x256xf32> to vector<8x256xf32>
    %331 = vector.extract_strided_slice %327 {offsets = [56, 0], sizes = [8, 256], strides = [1, 1]} : vector<64x256xf32> to vector<8x256xf32>
    %332 = vector.shape_cast %22 : vector<1x256xi1> to vector<1x256xi1>
    %333 = vector.broadcast %332 : vector<1x256xi1> to vector<8x256xi1>
    %334 = arith.select %333, %330, %331 : vector<8x256xi1>, vector<8x256xf32>
    %335 = arith.truncf %328 : vector<8x64xf32> to vector<8x64xbf16>
    %cst_61 = arith.constant dense<0.000000e+00> : vector<8x256xf32>
    %336 = tpu.matmul %335, %323, %cst_61 {dimension_numbers = #tpu.dot_dimension_numbers<[1], [0], [0], [1], [0, 0, 1, 1], [], []>} : vector<8x64xbf16>, vector<64x256xbf16>, vector<8x256xf32> -> vector<8x256xf32>
    %337 = arith.addf %334, %336 : vector<8x256xf32>
    %338 = arith.negf %337 : vector<8x256xf32>
    %339 = math.exp %338 : vector<8x256xf32>
    %cst_62 = arith.constant 1.000000e+00 : f32
    %340 = vector.broadcast %cst_62 : f32 to vector<8x256xf32>
    %341 = arith.addf %340, %339 : vector<8x256xf32>
    %342 = arith.divf %340, %341 : vector<8x256xf32>
    %343 = math.tanh %337 : vector<8x256xf32>
    %344 = vector.extract_strided_slice %342 {offsets = [0, 0], sizes = [8, 64], strides = [1, 1]} : vector<8x256xf32> to vector<8x64xf32>
    %345 = vector.extract_strided_slice %342 {offsets = [0, 64], sizes = [8, 64], strides = [1, 1]} : vector<8x256xf32> to vector<8x64xf32>
    %346 = vector.extract_strided_slice %343 {offsets = [0, 128], sizes = [8, 64], strides = [1, 1]} : vector<8x256xf32> to vector<8x64xf32>
    %347 = vector.extract_strided_slice %342 {offsets = [0, 192], sizes = [8, 64], strides = [1, 1]} : vector<8x256xf32> to vector<8x64xf32>
    %348 = arith.mulf %345, %329 : vector<8x64xf32>
    %349 = arith.mulf %344, %346 : vector<8x64xf32>
    %350 = arith.addf %348, %349 : vector<8x64xf32>
    %351 = math.tanh %350 : vector<8x64xf32>
    %352 = arith.mulf %347, %351 : vector<8x64xf32>
    %353 = arith.select %32, %352, %328 : vector<8x64xi1>, vector<8x64xf32>
    %354 = arith.select %32, %350, %329 : vector<8x64xi1>, vector<8x64xf32>
    %355 = vector.extract_strided_slice %327 {offsets = [8, 0], sizes = [8, 256], strides = [1, 1]} : vector<64x256xf32> to vector<8x256xf32>
    %356 = vector.extract_strided_slice %327 {offsets = [48, 0], sizes = [8, 256], strides = [1, 1]} : vector<64x256xf32> to vector<8x256xf32>
    %357 = vector.shape_cast %22 : vector<1x256xi1> to vector<1x256xi1>
    %358 = vector.broadcast %357 : vector<1x256xi1> to vector<8x256xi1>
    %359 = arith.select %358, %355, %356 : vector<8x256xi1>, vector<8x256xf32>
    %360 = arith.truncf %353 : vector<8x64xf32> to vector<8x64xbf16>
    %cst_63 = arith.constant dense<0.000000e+00> : vector<8x256xf32>
    %361 = tpu.matmul %360, %323, %cst_63 {dimension_numbers = #tpu.dot_dimension_numbers<[1], [0], [0], [1], [0, 0, 1, 1], [], []>} : vector<8x64xbf16>, vector<64x256xbf16>, vector<8x256xf32> -> vector<8x256xf32>
    %362 = arith.addf %359, %361 : vector<8x256xf32>
    %363 = arith.negf %362 : vector<8x256xf32>
    %364 = math.exp %363 : vector<8x256xf32>
    %cst_64 = arith.constant 1.000000e+00 : f32
    %365 = vector.broadcast %cst_64 : f32 to vector<8x256xf32>
    %366 = arith.addf %365, %364 : vector<8x256xf32>
    %367 = arith.divf %365, %366 : vector<8x256xf32>
    %368 = math.tanh %362 : vector<8x256xf32>
    %369 = vector.extract_strided_slice %367 {offsets = [0, 0], sizes = [8, 64], strides = [1, 1]} : vector<8x256xf32> to vector<8x64xf32>
    %370 = vector.extract_strided_slice %367 {offsets = [0, 64], sizes = [8, 64], strides = [1, 1]} : vector<8x256xf32> to vector<8x64xf32>
    %371 = vector.extract_strided_slice %368 {offsets = [0, 128], sizes = [8, 64], strides = [1, 1]} : vector<8x256xf32> to vector<8x64xf32>
    %372 = vector.extract_strided_slice %367 {offsets = [0, 192], sizes = [8, 64], strides = [1, 1]} : vector<8x256xf32> to vector<8x64xf32>
    %373 = arith.mulf %370, %354 : vector<8x64xf32>
    %374 = arith.mulf %369, %371 : vector<8x64xf32>
    %375 = arith.addf %373, %374 : vector<8x64xf32>
    %376 = math.tanh %375 : vector<8x64xf32>
    %377 = arith.mulf %372, %376 : vector<8x64xf32>
    %378 = arith.select %41, %377, %353 : vector<8x64xi1>, vector<8x64xf32>
    %379 = arith.select %41, %375, %354 : vector<8x64xi1>, vector<8x64xf32>
    %380 = vector.extract_strided_slice %327 {offsets = [16, 0], sizes = [8, 256], strides = [1, 1]} : vector<64x256xf32> to vector<8x256xf32>
    %381 = vector.extract_strided_slice %327 {offsets = [40, 0], sizes = [8, 256], strides = [1, 1]} : vector<64x256xf32> to vector<8x256xf32>
    %382 = vector.shape_cast %22 : vector<1x256xi1> to vector<1x256xi1>
    %383 = vector.broadcast %382 : vector<1x256xi1> to vector<8x256xi1>
    %384 = arith.select %383, %380, %381 : vector<8x256xi1>, vector<8x256xf32>
    %385 = arith.truncf %378 : vector<8x64xf32> to vector<8x64xbf16>
    %cst_65 = arith.constant dense<0.000000e+00> : vector<8x256xf32>
    %386 = tpu.matmul %385, %323, %cst_65 {dimension_numbers = #tpu.dot_dimension_numbers<[1], [0], [0], [1], [0, 0, 1, 1], [], []>} : vector<8x64xbf16>, vector<64x256xbf16>, vector<8x256xf32> -> vector<8x256xf32>
    %387 = arith.addf %384, %386 : vector<8x256xf32>
    %388 = arith.negf %387 : vector<8x256xf32>
    %389 = math.exp %388 : vector<8x256xf32>
    %cst_66 = arith.constant 1.000000e+00 : f32
    %390 = vector.broadcast %cst_66 : f32 to vector<8x256xf32>
    %391 = arith.addf %390, %389 : vector<8x256xf32>
    %392 = arith.divf %390, %391 : vector<8x256xf32>
    %393 = math.tanh %387 : vector<8x256xf32>
    %394 = vector.extract_strided_slice %392 {offsets = [0, 0], sizes = [8, 64], strides = [1, 1]} : vector<8x256xf32> to vector<8x64xf32>
    %395 = vector.extract_strided_slice %392 {offsets = [0, 64], sizes = [8, 64], strides = [1, 1]} : vector<8x256xf32> to vector<8x64xf32>
    %396 = vector.extract_strided_slice %393 {offsets = [0, 128], sizes = [8, 64], strides = [1, 1]} : vector<8x256xf32> to vector<8x64xf32>
    %397 = vector.extract_strided_slice %392 {offsets = [0, 192], sizes = [8, 64], strides = [1, 1]} : vector<8x256xf32> to vector<8x64xf32>
    %398 = arith.mulf %395, %379 : vector<8x64xf32>
    %399 = arith.mulf %394, %396 : vector<8x64xf32>
    %400 = arith.addf %398, %399 : vector<8x64xf32>
    %401 = math.tanh %400 : vector<8x64xf32>
    %402 = arith.mulf %397, %401 : vector<8x64xf32>
    %403 = arith.select %50, %402, %378 : vector<8x64xi1>, vector<8x64xf32>
    %404 = arith.select %50, %400, %379 : vector<8x64xi1>, vector<8x64xf32>
    %405 = vector.extract_strided_slice %327 {offsets = [24, 0], sizes = [8, 256], strides = [1, 1]} : vector<64x256xf32> to vector<8x256xf32>
    %406 = vector.extract_strided_slice %327 {offsets = [32, 0], sizes = [8, 256], strides = [1, 1]} : vector<64x256xf32> to vector<8x256xf32>
    %407 = vector.shape_cast %22 : vector<1x256xi1> to vector<1x256xi1>
    %408 = vector.broadcast %407 : vector<1x256xi1> to vector<8x256xi1>
    %409 = arith.select %408, %405, %406 : vector<8x256xi1>, vector<8x256xf32>
    %410 = arith.truncf %403 : vector<8x64xf32> to vector<8x64xbf16>
    %cst_67 = arith.constant dense<0.000000e+00> : vector<8x256xf32>
    %411 = tpu.matmul %410, %323, %cst_67 {dimension_numbers = #tpu.dot_dimension_numbers<[1], [0], [0], [1], [0, 0, 1, 1], [], []>} : vector<8x64xbf16>, vector<64x256xbf16>, vector<8x256xf32> -> vector<8x256xf32>
    %412 = arith.addf %409, %411 : vector<8x256xf32>
    %413 = arith.negf %412 : vector<8x256xf32>
    %414 = math.exp %413 : vector<8x256xf32>
    %cst_68 = arith.constant 1.000000e+00 : f32
    %415 = vector.broadcast %cst_68 : f32 to vector<8x256xf32>
    %416 = arith.addf %415, %414 : vector<8x256xf32>
    %417 = arith.divf %415, %416 : vector<8x256xf32>
    %418 = math.tanh %412 : vector<8x256xf32>
    %419 = vector.extract_strided_slice %417 {offsets = [0, 0], sizes = [8, 64], strides = [1, 1]} : vector<8x256xf32> to vector<8x64xf32>
    %420 = vector.extract_strided_slice %417 {offsets = [0, 64], sizes = [8, 64], strides = [1, 1]} : vector<8x256xf32> to vector<8x64xf32>
    %421 = vector.extract_strided_slice %418 {offsets = [0, 128], sizes = [8, 64], strides = [1, 1]} : vector<8x256xf32> to vector<8x64xf32>
    %422 = vector.extract_strided_slice %417 {offsets = [0, 192], sizes = [8, 64], strides = [1, 1]} : vector<8x256xf32> to vector<8x64xf32>
    %423 = arith.mulf %420, %404 : vector<8x64xf32>
    %424 = arith.mulf %419, %421 : vector<8x64xf32>
    %425 = arith.addf %423, %424 : vector<8x64xf32>
    %426 = math.tanh %425 : vector<8x64xf32>
    %427 = arith.mulf %422, %426 : vector<8x64xf32>
    %428 = arith.select %59, %427, %403 : vector<8x64xi1>, vector<8x64xf32>
    %429 = arith.select %59, %425, %404 : vector<8x64xi1>, vector<8x64xf32>
    %430 = vector.extract_strided_slice %327 {offsets = [32, 0], sizes = [8, 256], strides = [1, 1]} : vector<64x256xf32> to vector<8x256xf32>
    %431 = vector.extract_strided_slice %327 {offsets = [24, 0], sizes = [8, 256], strides = [1, 1]} : vector<64x256xf32> to vector<8x256xf32>
    %432 = vector.shape_cast %22 : vector<1x256xi1> to vector<1x256xi1>
    %433 = vector.broadcast %432 : vector<1x256xi1> to vector<8x256xi1>
    %434 = arith.select %433, %430, %431 : vector<8x256xi1>, vector<8x256xf32>
    %435 = arith.truncf %428 : vector<8x64xf32> to vector<8x64xbf16>
    %cst_69 = arith.constant dense<0.000000e+00> : vector<8x256xf32>
    %436 = tpu.matmul %435, %323, %cst_69 {dimension_numbers = #tpu.dot_dimension_numbers<[1], [0], [0], [1], [0, 0, 1, 1], [], []>} : vector<8x64xbf16>, vector<64x256xbf16>, vector<8x256xf32> -> vector<8x256xf32>
    %437 = arith.addf %434, %436 : vector<8x256xf32>
    %438 = arith.negf %437 : vector<8x256xf32>
    %439 = math.exp %438 : vector<8x256xf32>
    %cst_70 = arith.constant 1.000000e+00 : f32
    %440 = vector.broadcast %cst_70 : f32 to vector<8x256xf32>
    %441 = arith.addf %440, %439 : vector<8x256xf32>
    %442 = arith.divf %440, %441 : vector<8x256xf32>
    %443 = math.tanh %437 : vector<8x256xf32>
    %444 = vector.extract_strided_slice %442 {offsets = [0, 0], sizes = [8, 64], strides = [1, 1]} : vector<8x256xf32> to vector<8x64xf32>
    %445 = vector.extract_strided_slice %442 {offsets = [0, 64], sizes = [8, 64], strides = [1, 1]} : vector<8x256xf32> to vector<8x64xf32>
    %446 = vector.extract_strided_slice %443 {offsets = [0, 128], sizes = [8, 64], strides = [1, 1]} : vector<8x256xf32> to vector<8x64xf32>
    %447 = vector.extract_strided_slice %442 {offsets = [0, 192], sizes = [8, 64], strides = [1, 1]} : vector<8x256xf32> to vector<8x64xf32>
    %448 = arith.mulf %445, %429 : vector<8x64xf32>
    %449 = arith.mulf %444, %446 : vector<8x64xf32>
    %450 = arith.addf %448, %449 : vector<8x64xf32>
    %451 = math.tanh %450 : vector<8x64xf32>
    %452 = arith.mulf %447, %451 : vector<8x64xf32>
    %453 = arith.select %68, %452, %428 : vector<8x64xi1>, vector<8x64xf32>
    %454 = arith.select %68, %450, %429 : vector<8x64xi1>, vector<8x64xf32>
    %455 = vector.extract_strided_slice %327 {offsets = [40, 0], sizes = [8, 256], strides = [1, 1]} : vector<64x256xf32> to vector<8x256xf32>
    %456 = vector.extract_strided_slice %327 {offsets = [16, 0], sizes = [8, 256], strides = [1, 1]} : vector<64x256xf32> to vector<8x256xf32>
    %457 = vector.shape_cast %22 : vector<1x256xi1> to vector<1x256xi1>
    %458 = vector.broadcast %457 : vector<1x256xi1> to vector<8x256xi1>
    %459 = arith.select %458, %455, %456 : vector<8x256xi1>, vector<8x256xf32>
    %460 = arith.truncf %453 : vector<8x64xf32> to vector<8x64xbf16>
    %cst_71 = arith.constant dense<0.000000e+00> : vector<8x256xf32>
    %461 = tpu.matmul %460, %323, %cst_71 {dimension_numbers = #tpu.dot_dimension_numbers<[1], [0], [0], [1], [0, 0, 1, 1], [], []>} : vector<8x64xbf16>, vector<64x256xbf16>, vector<8x256xf32> -> vector<8x256xf32>
    %462 = arith.addf %459, %461 : vector<8x256xf32>
    %463 = arith.negf %462 : vector<8x256xf32>
    %464 = math.exp %463 : vector<8x256xf32>
    %cst_72 = arith.constant 1.000000e+00 : f32
    %465 = vector.broadcast %cst_72 : f32 to vector<8x256xf32>
    %466 = arith.addf %465, %464 : vector<8x256xf32>
    %467 = arith.divf %465, %466 : vector<8x256xf32>
    %468 = math.tanh %462 : vector<8x256xf32>
    %469 = vector.extract_strided_slice %467 {offsets = [0, 0], sizes = [8, 64], strides = [1, 1]} : vector<8x256xf32> to vector<8x64xf32>
    %470 = vector.extract_strided_slice %467 {offsets = [0, 64], sizes = [8, 64], strides = [1, 1]} : vector<8x256xf32> to vector<8x64xf32>
    %471 = vector.extract_strided_slice %468 {offsets = [0, 128], sizes = [8, 64], strides = [1, 1]} : vector<8x256xf32> to vector<8x64xf32>
    %472 = vector.extract_strided_slice %467 {offsets = [0, 192], sizes = [8, 64], strides = [1, 1]} : vector<8x256xf32> to vector<8x64xf32>
    %473 = arith.mulf %470, %454 : vector<8x64xf32>
    %474 = arith.mulf %469, %471 : vector<8x64xf32>
    %475 = arith.addf %473, %474 : vector<8x64xf32>
    %476 = math.tanh %475 : vector<8x64xf32>
    %477 = arith.mulf %472, %476 : vector<8x64xf32>
    %478 = arith.select %77, %477, %453 : vector<8x64xi1>, vector<8x64xf32>
    %479 = arith.select %77, %475, %454 : vector<8x64xi1>, vector<8x64xf32>
    %480 = vector.extract_strided_slice %327 {offsets = [48, 0], sizes = [8, 256], strides = [1, 1]} : vector<64x256xf32> to vector<8x256xf32>
    %481 = vector.extract_strided_slice %327 {offsets = [8, 0], sizes = [8, 256], strides = [1, 1]} : vector<64x256xf32> to vector<8x256xf32>
    %482 = vector.shape_cast %22 : vector<1x256xi1> to vector<1x256xi1>
    %483 = vector.broadcast %482 : vector<1x256xi1> to vector<8x256xi1>
    %484 = arith.select %483, %480, %481 : vector<8x256xi1>, vector<8x256xf32>
    %485 = arith.truncf %478 : vector<8x64xf32> to vector<8x64xbf16>
    %cst_73 = arith.constant dense<0.000000e+00> : vector<8x256xf32>
    %486 = tpu.matmul %485, %323, %cst_73 {dimension_numbers = #tpu.dot_dimension_numbers<[1], [0], [0], [1], [0, 0, 1, 1], [], []>} : vector<8x64xbf16>, vector<64x256xbf16>, vector<8x256xf32> -> vector<8x256xf32>
    %487 = arith.addf %484, %486 : vector<8x256xf32>
    %488 = arith.negf %487 : vector<8x256xf32>
    %489 = math.exp %488 : vector<8x256xf32>
    %cst_74 = arith.constant 1.000000e+00 : f32
    %490 = vector.broadcast %cst_74 : f32 to vector<8x256xf32>
    %491 = arith.addf %490, %489 : vector<8x256xf32>
    %492 = arith.divf %490, %491 : vector<8x256xf32>
    %493 = math.tanh %487 : vector<8x256xf32>
    %494 = vector.extract_strided_slice %492 {offsets = [0, 0], sizes = [8, 64], strides = [1, 1]} : vector<8x256xf32> to vector<8x64xf32>
    %495 = vector.extract_strided_slice %492 {offsets = [0, 64], sizes = [8, 64], strides = [1, 1]} : vector<8x256xf32> to vector<8x64xf32>
    %496 = vector.extract_strided_slice %493 {offsets = [0, 128], sizes = [8, 64], strides = [1, 1]} : vector<8x256xf32> to vector<8x64xf32>
    %497 = vector.extract_strided_slice %492 {offsets = [0, 192], sizes = [8, 64], strides = [1, 1]} : vector<8x256xf32> to vector<8x64xf32>
    %498 = arith.mulf %495, %479 : vector<8x64xf32>
    %499 = arith.mulf %494, %496 : vector<8x64xf32>
    %500 = arith.addf %498, %499 : vector<8x64xf32>
    %501 = math.tanh %500 : vector<8x64xf32>
    %502 = arith.mulf %497, %501 : vector<8x64xf32>
    %503 = arith.select %86, %502, %478 : vector<8x64xi1>, vector<8x64xf32>
    %504 = arith.select %86, %500, %479 : vector<8x64xi1>, vector<8x64xf32>
    %505 = vector.extract_strided_slice %327 {offsets = [56, 0], sizes = [8, 256], strides = [1, 1]} : vector<64x256xf32> to vector<8x256xf32>
    %506 = vector.extract_strided_slice %327 {offsets = [0, 0], sizes = [8, 256], strides = [1, 1]} : vector<64x256xf32> to vector<8x256xf32>
    %507 = vector.shape_cast %22 : vector<1x256xi1> to vector<1x256xi1>
    %508 = vector.broadcast %507 : vector<1x256xi1> to vector<8x256xi1>
    %509 = arith.select %508, %505, %506 : vector<8x256xi1>, vector<8x256xf32>
    %510 = arith.truncf %503 : vector<8x64xf32> to vector<8x64xbf16>
    %cst_75 = arith.constant dense<0.000000e+00> : vector<8x256xf32>
    %511 = tpu.matmul %510, %323, %cst_75 {dimension_numbers = #tpu.dot_dimension_numbers<[1], [0], [0], [1], [0, 0, 1, 1], [], []>} : vector<8x64xbf16>, vector<64x256xbf16>, vector<8x256xf32> -> vector<8x256xf32>
    %512 = arith.addf %509, %511 : vector<8x256xf32>
    %513 = arith.negf %512 : vector<8x256xf32>
    %514 = math.exp %513 : vector<8x256xf32>
    %cst_76 = arith.constant 1.000000e+00 : f32
    %515 = vector.broadcast %cst_76 : f32 to vector<8x256xf32>
    %516 = arith.addf %515, %514 : vector<8x256xf32>
    %517 = arith.divf %515, %516 : vector<8x256xf32>
    %518 = math.tanh %512 : vector<8x256xf32>
    %519 = vector.extract_strided_slice %517 {offsets = [0, 0], sizes = [8, 64], strides = [1, 1]} : vector<8x256xf32> to vector<8x64xf32>
    %520 = vector.extract_strided_slice %517 {offsets = [0, 64], sizes = [8, 64], strides = [1, 1]} : vector<8x256xf32> to vector<8x64xf32>
    %521 = vector.extract_strided_slice %518 {offsets = [0, 128], sizes = [8, 64], strides = [1, 1]} : vector<8x256xf32> to vector<8x64xf32>
    %522 = vector.extract_strided_slice %517 {offsets = [0, 192], sizes = [8, 64], strides = [1, 1]} : vector<8x256xf32> to vector<8x64xf32>
    %523 = arith.mulf %520, %504 : vector<8x64xf32>
    %524 = arith.mulf %519, %521 : vector<8x64xf32>
    %525 = arith.addf %523, %524 : vector<8x64xf32>
    %526 = math.tanh %525 : vector<8x64xf32>
    %527 = arith.mulf %522, %526 : vector<8x64xf32>
    %528 = arith.select %95, %527, %503 : vector<8x64xi1>, vector<8x64xf32>
    %c0_77 = arith.constant 0 : index
    %c0_78 = arith.constant 0 : index
    %529 = vector.load %arg10[%c0_77, %c0_78] : memref<64x4xf32, #tpu.memory_space<vmem>>, vector<64x4xf32>
    %cst_79 = arith.constant dense<0.000000e+00> : vector<8x4xf32>
    %530 = tpu.matmul %528, %529, %cst_79 {dimension_numbers = #tpu.dot_dimension_numbers<[1], [0], [0], [1], [0, 0, 1, 1], [], []>} : vector<8x64xf32>, vector<64x4xf32>, vector<8x4xf32> -> vector<8x4xf32>
    %c0_80 = arith.constant 0 : index
    %c0_81 = arith.constant 0 : index
    %531 = vector.load %arg11[%c0_80, %c0_81] : memref<1x4xf32, #tpu.memory_space<vmem>>, vector<1x4xf32>
    %532 = vector.broadcast %531 : vector<1x4xf32> to vector<8x4xf32>
    %533 = arith.addf %530, %532 : vector<8x4xf32>
    %c0_82 = arith.constant 0 : index
    %c0_83 = arith.constant 0 : index
    %534 = vector.load %arg12[%c0_82, %c0_83] : memref<8x4xf32, #tpu.memory_space<vmem>>, vector<8x4xf32>
    tpu.vector_store %arg12[%c0_82, %c0_83], %533 {strides = array<i32>} : memref<8x4xf32, #tpu.memory_space<vmem>>, vector<8x4xf32>,
    return
  }
  func.func @transform_0(%arg0: i32) -> (i32, i32) {
    %c0_i32 = arith.constant 0 : i32
    %c0_i32_0 = arith.constant 0 : i32
    %c0_i32_1 = arith.constant 0 : i32
    return %c0_i32, %c0_i32_0 : i32, i32
  }
  func.func @transform_1(%arg0: i32) -> (i32, i32) {
    %c0_i32 = arith.constant 0 : i32
    %c0_i32_0 = arith.constant 0 : i32
    %c0_i32_1 = arith.constant 0 : i32
    return %c0_i32, %c0_i32_0 : i32, i32
  }
  func.func @transform_2(%arg0: i32) -> (i32, i32) {
    %c0_i32 = arith.constant 0 : i32
    %c0_i32_0 = arith.constant 0 : i32
    %c0_i32_1 = arith.constant 0 : i32
    return %c0_i32, %c0_i32_0 : i32, i32
  }
  func.func @transform_3(%arg0: i32) -> (i32, i32) {
    %c0_i32 = arith.constant 0 : i32
    %c0_i32_0 = arith.constant 0 : i32
    %c0_i32_1 = arith.constant 0 : i32
    return %c0_i32, %c0_i32_0 : i32, i32
  }
  func.func @transform_4(%arg0: i32) -> (i32, i32) {
    %c0_i32 = arith.constant 0 : i32
    %c0_i32_0 = arith.constant 0 : i32
    %c0_i32_1 = arith.constant 0 : i32
    return %c0_i32, %c0_i32_0 : i32, i32
  }
  func.func @transform_5(%arg0: i32) -> (i32, i32) {
    %c0_i32 = arith.constant 0 : i32
    %c0_i32_0 = arith.constant 0 : i32
    %c0_i32_1 = arith.constant 0 : i32
    return %c0_i32, %c0_i32_0 : i32, i32
  }
  func.func @transform_6(%arg0: i32) -> (i32, i32) {
    %c0_i32 = arith.constant 0 : i32
    %c0_i32_0 = arith.constant 0 : i32
    %c0_i32_1 = arith.constant 0 : i32
    return %c0_i32, %c0_i32_0 : i32, i32
  }
  func.func @transform_7(%arg0: i32) -> (i32, i32) {
    %c0_i32 = arith.constant 0 : i32
    %c0_i32_0 = arith.constant 0 : i32
    %c0_i32_1 = arith.constant 0 : i32
    return %c0_i32, %c0_i32_0 : i32, i32
  }
  func.func @transform_8(%arg0: i32) -> (i32, i32) {
    %c0_i32 = arith.constant 0 : i32
    %c0_i32_0 = arith.constant 0 : i32
    %c0_i32_1 = arith.constant 0 : i32
    return %c0_i32, %c0_i32_0 : i32, i32
  }
  func.func @transform_9(%arg0: i32) -> (i32, i32) {
    %c0_i32 = arith.constant 0 : i32
    %c0_i32_0 = arith.constant 0 : i32
    %c0_i32_1 = arith.constant 0 : i32
    return %c0_i32, %c0_i32_0 : i32, i32
  }
  func.func @transform_10(%arg0: i32) -> (i32, i32) {
    %c0_i32 = arith.constant 0 : i32
    %c0_i32_0 = arith.constant 0 : i32
    %c0_i32_1 = arith.constant 0 : i32
    return %c0_i32, %c0_i32_0 : i32, i32
  }
  func.func @transform_11(%arg0: i32) -> (i32, i32) {
    %c0_i32 = arith.constant 0 : i32
    %c0_i32_0 = arith.constant 0 : i32
    %c0_i32_1 = arith.constant 0 : i32
    return %c0_i32, %c0_i32_0 : i32, i32
  }
}

</mosaic_0001>

<bundles_post_ra>
// kernel: bilstm_forward.1
= control target key start
LH: loop header
LB: loop body
LE: loop exit
PB: predicated region body
PF: predicated region fallthrough
CT: control target
= control target key end

     0   :  { %v2575_v0 = vmov 0   ;;  %v40_v8 = vlaneseq  ;;  %v2576_v59 = vmov 1.0   ;;  %vm326_vm9 = vcmask 261120   ;;  %s3661_s0 = inlined_call_operand.vmem [shape: s32[64,1], index: 0, kind: input, shape index: {}]   ;;  %s3662_s2 = inlined_call_operand.vmem [shape: f32[128,32], index: 2, kind: input, shape index: {}]   ;;  %s3663_s1 = inlined_call_operand.vmem [shape: s32[8,1], index: 1, kind: input, shape index: {}]   ;;  %s3664_s3 = inlined_call_operand.vmem [shape: bf16[32,256], index: 3, kind: input, shape index: {}]   ;;  %s3665_s4 = inlined_call_operand.vmem [shape: bf16[64,256], index: 4, kind: input, shape index: {}]   ;;  %s3666_s5 = inlined_call_operand.vmem [shape: f32[1,256], index: 5, kind: input, shape index: {}]   ;;  %s3667_s6 = inlined_call_operand.vmem [shape: bf16[64,256], index: 6, kind: input, shape index: {}]   ;;  %s3668_s7 = inlined_call_operand.vmem [shape: bf16[64,256], index: 7, kind: input, shape index: {}]   ;;  %s3669_s8 = inlined_call_operand.vmem [shape: f32[1,256], index: 8, kind: input, shape index: {}]   ;;  %s3670_s9 = inlined_call_operand.vmem [shape: f32[64,4], index: 9, kind: input, shape index: {}]   ;;  %s3671_s10 = inlined_call_operand.vmem [shape: f32[1,4], index: 10, kind: input, shape index: {}]   ;;  %s3672_s11 = inlined_call_operand.vmem [shape: f32[8,4], index: 11, kind: output, shape index: {}]  }
   0x1   :  { %2340 = vset.pattern.permute.xlu1 %v2575_v0  ;;  %2339 = vset.pattern.permute.xlu0 %v2575_v0  ;;  %v103_v1 = vld [vmem:[%s3661_s0 + $0x10] sm:$0xff]  ;;  %v101_v2 = vld [vmem:[%s3661_s0] sm:$0xff]  ;;  %v104_v3 = vld [vmem:[%s3661_s0 + $0x18] sm:$0xff]  ;;  %vm458_vm13 = vcmask 523264  }
   0x2   :  { %116 = vperm.xlu1 %2340, %v103_v1   ;;  %110 = vperm.xlu0 %2339, %v101_v2   ;;  %v102_v4 = vld [vmem:[%s3661_s0 + $0x8] sm:$0xff]  ;;  %v157_v5 = vld [vmem:[%s3662_s2] sm:$0xff]  ;;  %v159_v7 = vld [vmem:[%s3662_s2 + $0x10] sm:$0xff]  ;;  %v2681_v16 = vand.u32 127, %v40_v8 }
   0x3   :  { %371 = vmatprep.mubr.bf16.mxu1 %v2575_v0  ;;  %v158_v6 = vld [vmem:[%s3662_s2 + $0x8] sm:$0xff]  ;;  %v160_v10 = vld [vmem:[%s3662_s2 + $0x18] sm:$0xff]  ;;  %v161_v12 = vld [vmem:[%s3662_s2 + $0x20] sm:$0xff] }
   0x4   :  { %v2289_v9 = vpack.c.bf16 %v158_v6, %v157_v5  ;;  %v2293_v11 = vpack.c.bf16 %v160_v10, %v159_v7  ;;  %v162_v13 = vld [vmem:[%s3662_s2 + $0x28] sm:$0xff]  ;;  %v105_v15 = vld [vmem:[%s3661_s0 + $0x20] sm:$0xff]  ;;  %v163_v18 = vld [vmem:[%s3662_s2 + $0x30] sm:$0xff]  ;;  %vm42_vm0 = vcmp.lt.s32.totalorder %v2681_v16, 32 }
   0x5   :  { %v106_v14 = vld [vmem:[%s3661_s0 + $0x28] sm:$0xff]  ;;  %v2297_v17 = vpack.c.bf16 %v162_v13, %v161_v12  ;;  %v164_v19 = vld [vmem:[%s3662_s2 + $0x38] sm:$0xff]  ;;  %v107_v21 = vld [vmem:[%s3661_s0 + $0x30] sm:$0xff]  ;;  %v2699_v22 = vsel %vm42_vm0, 1, %v2575_v0 }
   0x6   :  { %119 = vperm.xlu1 %2340, %v104_v3   ;;  %113 = vperm.xlu0 %2339, %v102_v4   ;;  %v108_v20 = vld [vmem:[%s3661_s0 + $0x38] sm:$0xff]  ;;  %v2702_v23 = vsub.s32 1, %v2699_v22  ;;  %v2301_v24 = vpack.c.bf16 %v164_v19, %v163_v18  ;;  %v165_v25 = vld [vmem:[%s3662_s2 + $0x40] sm:$0xff]  ;;  %v166_v26 = vld [vmem:[%s3662_s2 + $0x48] sm:$0xff]  ;;  %v80_v28 = vmul.u32 2, %v2699_v22  ;;  %v84_v31 = vmul.u32 3, %v2699_v22 }
   0x7   :  { %2290 = vmatprep.subr.bf16.mxu0 %v2289_v9  ;;  %v39_v29 = vld [vmem:[%s3663_s1] sm:$0xff]  ;;  %v2305_v34 = vpack.c.bf16 %v166_v26, %v165_v25  ;;  %v88_v36 = vmul.u32 4, %v2699_v22  ;;  %v167_v38 = vld [vmem:[%s3662_s2 + $0x50] sm:$0xff]  ;;  %v168_v39 = vld [vmem:[%s3662_s2 + $0x58] sm:$0xff]  ;;  %v92_v41 = vmul.u32 5, %v2699_v22 }
   0x8   :  { %2292 = vmatpush3.bf16.msra.mxu0 %v2289_v9  ;;  %v77_v27 = vmul.u32 6, %v2702_v23  ;;  %v81_v30 = vmul.u32 5, %v2702_v23  ;;  %v2341_v45 = vld [vmem:[%s3664_s3 + $0x4] ss:$8 sps:$4 sm:$0xff]   ;;  %v2309_v47 = vpack.c.bf16 %v168_v39, %v167_v38  ;;  %v2343_v48 = vld [vmem:[%s3664_s3] ss:$8 sps:$4 sm:$0xff]  }
   0x9   :  { %2294 = vmatprep.subr.bf16.mxu0 %v2293_v11  ;;  %v85_v33 = vmul.u32 4, %v2702_v23  ;;  %v89_v37 = vmul.u32 3, %v2702_v23  ;;  %v169_v50 = vld [vmem:[%s3662_s2 + $0x60] sm:$0xff]  ;;  %v170_v51 = vld [vmem:[%s3662_s2 + $0x68] sm:$0xff]  ;;  %339 = vmatprep.subr.bf16.mxu1 %v2341_v45  ;;  %v2344_v52 = vld [vmem:[%s3664_s3 + $0x14] ss:$8 sps:$4 sm:$0xff]  }
   0xa   :  { %125 = vperm.xlu1 %2340, %v106_v14   ;;  %122 = vperm.xlu0 %2339, %v105_v15   ;;  %v2718_v32 = vadd.s32 %v77_v27, %v2699_v22  ;;  %v2721_v35 = vadd.s32 %v81_v30, %v80_v28  ;;  %v93_v42 = vmul.u32 2, %v2702_v23  ;;  %v96_v44 = vmul.u32 6, %v2699_v22  ;;  %v171_v54 = vld [vmem:[%s3662_s2 + $0x70] sm:$0xff]  ;;  %v172_v55 = vld [vmem:[%s3662_s2 + $0x78] sm:$0xff]  ;;  %v2779_v4 = vld [vmem:[%s3665_s4 + $0x4] ss:$8 sps:$4 sm:$0xff]  }
   0xb   :  { %v2731_v40 = vadd.s32 %v85_v33, %v84_v31  ;;  %v2735_v43 = vadd.s32 %v89_v37, %v88_v36  ;;  %340 = vmatpush1.bf16.msra.mxu1 %v2343_v48  ;;  %v2313_v53 = vpack.c.bf16 %v170_v51, %v169_v50  ;;  %v2317_v56 = vpack.c.bf16 %v172_v55, %v171_v54  ;;  %v2346_v3 = vld [vmem:[%s3664_s3 + $0x10] ss:$8 sps:$4 sm:$0xff]   ;;  %v2784_v5 = vld [vmem:[%s3665_s4] ss:$8 sps:$4 sm:$0xff]   ;;  %v2792_v6 = vld [vmem:[%s3665_s4 + $0x14] ss:$8 sps:$4 sm:$0xff]  }
   0xc   :  { %2296 = vmatpush3.bf16.msra.mxu0 %v2293_v11  ;;  %v2741_v46 = vadd.s32 %v93_v42, %v92_v41  ;;  %v2747_v49 = vadd.s32 %v96_v44, %v2702_v23  ;;  %341 = vmatprep.subr.bf16.mxu1 %v2344_v52  ;;  %v2797_v7 = vld [vmem:[%s3665_s4 + $0x10] ss:$8 sps:$4 sm:$0xff]   ;;  %v2803_v9 = vld [vmem:[%s3665_s4 + $0x24] ss:$8 sps:$4 sm:$0xff]   ;;  %v2810_v10 = vld [vmem:[%s3665_s4 + $0x20] ss:$8 sps:$4 sm:$0xff]  }
   0xd   :  { %2298 = vmatprep.subr.bf16.mxu0 %v2297_v17  ;;  %v2815_v11 = vld [vmem:[%s3665_s4 + $0x34] ss:$8 sps:$4 sm:$0xff]   ;;  %v2822_v12 = vld [vmem:[%s3665_s4 + $0x30] ss:$8 sps:$4 sm:$0xff]   ;;  %v2853_v28 = vshrl.u32 %v40_v8, 7  ;;  %v48_v54 = vand.u32 63, %v2681_v16 }
   0xe   :  { %131 = vperm.xlu1 %2340, %v108_v20   ;;  %128 = vperm.xlu0 %2339, %v107_v21   ;;  %v294_v30 = vld [vmem:[%s3666_s5] sm:$0x3]  ;;  %s2577_s5 = smov 64  }
   0xf   :  { %342 = vmatpush1.bf16.msra.mxu1 %v2346_v3  ;;  %v3673_v31 = vsub.s32 1, %v2853_v28  ;;  %vm2878_vm10 = vcmp.lt.s32.totalorder %v48_v54, 32 }
  0x10   :  { %2300 = vmatpush3.bf16.msra.mxu0 %v2297_v17  ;;  %462 = vmatprep.subr.bf16.mxu1 %v2779_v4 }
  0x11   :  { %2302 = vmatprep.subr.bf16.mxu0 %v2301_v24  ;;  %v303_v37 = vrot.slane %v294_v30, %v3673_v31 }
  0x12   :  { %74 = vperm.xlu1 %2340, %v39_v29   ;;  %v3674_v29 = vsub.s32 0, %v2853_v28 }
  0x14   :  { %2304 = vmatpush3.bf16.msra.mxu0 %v2301_v24 }
  0x15   :  { %2306 = vmatprep.subr.bf16.mxu0 %v2305_v34 }
  0x18   :  { %2308 = vmatpush3.bf16.msra.mxu0 %v2305_v34  ;;  %v299_v34 = vrot.slane %v294_v30, %v3674_v29 }
  0x19   :  { %2310 = vmatprep.subr.bf16.mxu0 %v2309_v47 }
  0x1c   :  { %2312 = vmatpush3.bf16.msra.mxu0 %v2309_v47  ;;  %v43_v47 = vadd.s32 128, %v2681_v16 }
  0x1d   :  { %2314 = vmatprep.subr.bf16.mxu0 %v2313_v53 }
  0x1e   :  { %v55_v55 = vand.u32 63, %v43_v47 }
  0x20   :  { %2316 = vmatpush3.bf16.msra.mxu0 %v2313_v53  ;;  %vm2884_vm11 = vcmp.lt.s32.totalorder %v55_v55, 32 }
  0x21   :  { %2318 = vmatprep.subr.bf16.mxu0 %v2317_v56 }
  0x24   :  { %2320 = vmatpush3.bf16.msra.mxu0 %v2317_v56 }
  0x25   :  { %543 = vmatprep.subr.bf16.mxu0 %v2779_v4 }
  0x81   :  { %v117_v57 = vpop.permute.xlu1 %116  ;;  %v111_v58 = vpop.permute.xlu0 %110 }
  0x82   :  { %vm133_vm1 = vcmp.eq.s32.totalorder %v2681_v16, %v111_v58  ;;  %vm135_vm2 = vcmp.eq.s32.totalorder %v2681_v16, %v117_v57 }
  0x83   :  { %2258 = vmatprep.mubr.msk.f32.mxu0 %vm133_vm1, %v2576_v59 }
  0x85   :  { %v120_v60 = vpop.permute.xlu1 %119  ;;  %v114_v61 = vpop.permute.xlu0 %113 }
  0x86   :  { %vm134_vm3 = vcmp.eq.s32.totalorder %v2681_v16, %v114_v61  ;;  %vm136_vm4 = vcmp.eq.s32.totalorder %v2681_v16, %v120_v60  ;;  %v1999_v60 = vld [vmem:[%s3670_s9] sm:$0xff] }
  0x87   :  { %2259 = vmatmul.mubr.msk.f32.vlgmr.msra.gmra.mrb[0].mxu0 %vm134_vm3, %v2576_v59 }
  0x88   :  { %2261 = vmatprep.mubr.msk.f32.mxu0 %vm135_vm2, %v2576_v59  ;;  %544 = vmatpush1.bf16.msra.mxu0 %v2784_v5 }
  0x89   :  { %v126_v62 = vpop.permute.xlu1 %125  ;;  %v123_v63 = vpop.permute.xlu0 %122  ;;  %545 = vmatprep.subr.bf16.mxu0 %v2792_v6 }
  0x8a   :  { %vm137_vm5 = vcmp.eq.s32.totalorder %v2681_v16, %v123_v63  ;;  %vm138_vm6 = vcmp.eq.s32.totalorder %v2681_v16, %v126_v62 }
  0x8b   :  { %2262 = vmatmul.mubr.msk.f32.gmra.mrb[2].mxu0 %vm136_vm4, %v2576_v59 }
  0x8c   :  { %2264 = vmatprep.mubr.msk.f32.mxu0 %vm137_vm5, %v2576_v59  ;;  %546 = vmatpush1.bf16.msra.mxu0 %v2797_v7 }
  0x8d   :  { %v129_v1 = vpop.permute.xlu0 %128  ;;  %v132_v2 = vpop.permute.xlu1 %131  ;;  %547 = vmatprep.subr.bf16.mxu0 %v2803_v9 }
  0x8e   :  { %vm139_vm7 = vcmp.eq.s32.totalorder %v2681_v16, %v129_v1  ;;  %vm140_vm8 = vcmp.eq.s32.totalorder %v2681_v16, %v132_v2  ;;  %v3689_v16 = vsub.s32 1, %v2853_v28 }
  0x8f   :  { %2265 = vmatmul.mubr.msk.f32.gmra.mrb[4].mxu0 %vm138_vm6, %v2576_v59  ;;  %vm2087_vm6 = vcmask 31744  }
  0x90   :  { %2267 = vmatprep.mubr.msk.f32.mxu0 %vm139_vm7, %v2576_v59  ;;  %548 = vmatpush1.bf16.msra.mxu0 %v2810_v10 }
  0x91   :  { %549 = vmatprep.subr.bf16.mxu0 %v2815_v11 }
  0x93   :  { %2268 = vmatmul.mubr.msk.f32.gmra.mrb[6].mxu0 %vm140_vm8, %v2576_v59 }
  0x94   :  { %575 = vmatprep.mubr.bf16.mxu0 %v2575_v0  ;;  %550 = vmatpush1.bf16.msra.mxu0 %v2822_v12 }
  0x95   :  { %713 = vmatprep.subr.bf16.mxu0 %v2779_v4 }
 0x15a   :  { %v2260_v13 = vpop.f32.mrb[0].mxu0 }
 0x15b   :  { %v239_v14 = vpop.f32.mrb[1].mxu0 }
 0x15c   :  { %v278_v15 = vpack.c.bf16 %v2260_v13, %v239_v14 }
 0x15e   :  { %v2263_v17 = vpop.f32.mrb[2].mxu0  ;;  %2113 = vmatmul.mubr.msk.bf16.vlgmr.msra.gmra.mrb[0].mxu1 %vm326_vm9, %v278_v15 }
 0x15f   :  { %463 = vmatpush1.bf16.msra.mxu1 %v2784_v5  ;;  %v249_v18 = vpop.f32.mrb[3].mxu0  ;;  %381 = vmatprep.mubr.bf16.mxu1 %v2575_v0 }
 0x160   :  { %v279_v19 = vpack.c.bf16 %v2263_v17, %v249_v18  ;;  %464 = vmatprep.subr.bf16.mxu1 %v2792_v6 }
 0x162   :  { %v2266_v20 = vpop.f32.mrb[4].mxu0 }
 0x163   :  { %v259_v21 = vpop.f32.mrb[5].mxu0  ;;  %465 = vmatpush1.bf16.msra.mxu1 %v2797_v7 }
 0x164   :  { %v280_v24 = vpack.c.bf16 %v2266_v20, %v259_v21  ;;  %466 = vmatprep.subr.bf16.mxu1 %v2803_v9 }
 0x166   :  { %v2269_v25 = vpop.f32.mrb[6].mxu0  ;;  %2114 = vmatmul.mubr.msk.bf16.gmra.mrb[4].mxu1 %vm326_vm9, %v279_v19 }
 0x167   :  { %v269_v26 = vpop.f32.mrb[7].mxu0  ;;  %391 = vmatprep.mubr.bf16.mxu1 %v2575_v0  ;;  %467 = vmatpush1.bf16.msra.mxu1 %v2810_v10 }
 0x168   :  { %v281_v27 = vpack.c.bf16 %v2269_v25, %v269_v26  ;;  %468 = vmatprep.subr.bf16.mxu1 %v2815_v11 }
 0x16b   :  { %469 = vmatpush1.bf16.msra.mxu1 %v2822_v12 }
 0x16c   :  { %628 = vmatprep.subr.bf16.mxu1 %v2779_v4 }
 0x16e   :  { %2115 = vmatmul.mubr.msk.bf16.gmra.mrb[8].mxu1 %vm326_vm9, %v280_v24 }
 0x16f   :  { %401 = vmatprep.mubr.bf16.mxu1 %v2575_v0 }
 0x176   :  { %2116 = vmatmul.mubr.msk.bf16.gmra.mrb[12].mxu1 %vm326_vm9, %v281_v27 }
 0x177   :  { %494 = vmatprep.mubr.bf16.mxu1 %v2575_v0 }
 0x17e   :  { %495 = vmatmul.mubr.bf16.vlgmr.msra.gmra.mrb[16].mxu1 %v2575_v0 }
 0x17f   :  { %629 = vmatpush1.bf16.msra.mxu1 %v2784_v5  ;;  %660 = vmatprep.mubr.bf16.mxu1 %v2575_v0 }
 0x180   :  { %630 = vmatprep.subr.bf16.mxu1 %v2792_v6 }
 0x183   :  { %631 = vmatpush1.bf16.msra.mxu1 %v2797_v7 }
 0x184   :  { %632 = vmatprep.subr.bf16.mxu1 %v2803_v9 }
 0x187   :  { %633 = vmatpush1.bf16.msra.mxu1 %v2810_v10 }
 0x188   :  { %634 = vmatprep.subr.bf16.mxu1 %v2815_v11 }
 0x18b   :  { %635 = vmatpush1.bf16.msra.mxu1 %v2822_v12 }
 0x18c   :  { %798 = vmatprep.subr.bf16.mxu1 %v2779_v4 }
 0x231   :  { %v373_v33 = vpop.f32.mrb[0].mxu1 }
 0x232   :  { %v375_v36 = vpop.f32.mrb[1].mxu1  ;;  %v2930_v30 = vadd.f32 %v373_v33, %v299_v34 }
 0x233   :  { %v377_v38 = vpop.f32.mrb[2].mxu1  ;;  %v2942_v47 = vadd.f32 %v375_v36, %v303_v37 }
 0x234   :  { %v2864_v39 = vadd.f32 %v377_v38, %v299_v34  ;;  %v379_v8 = vpop.f32.mrb[3].mxu1 }
 0x235   :  { %v2866_v41 = vadd.f32 %v379_v8, %v303_v37 }
 0x239   :  { %v383_v42 = vpop.f32.mrb[4].mxu1 }
 0x23a   :  { %v2868_v44 = vadd.f32 %v383_v42, %v299_v34  ;;  %v385_v45 = vpop.f32.mrb[5].mxu1 }
 0x23b   :  { %v2871_v48 = vadd.f32 %v385_v45, %v303_v37  ;;  %v387_v50 = vpop.f32.mrb[6].mxu1 }
 0x23c   :  { %v2873_v51 = vadd.f32 %v387_v50, %v299_v34  ;;  %v389_v52 = vpop.f32.mrb[7].mxu1 }
 0x23d   :  { %v2875_v53 = vadd.f32 %v389_v52, %v303_v37 }
 0x241   :  { %v393_v56 = vpop.f32.mrb[8].mxu1 }
 0x242   :  { %v2882_v58 = vadd.f32 %v393_v56, %v299_v34  ;;  %v395_v59 = vpop.f32.mrb[9].mxu1 }
 0x243   :  { %v2888_v61 = vadd.f32 %v395_v59, %v303_v37  ;;  %v397_v62 = vpop.f32.mrb[10].mxu1 }
 0x244   :  { %v2890_v63 = vadd.f32 %v397_v62, %v299_v34  ;;  %v399_v1 = vpop.f32.mrb[11].mxu1  ;;  %v707_v2 = vsel %vm2878_vm10, %v2873_v51, %v2882_v58  ;;  %v792_v3 = vsel %vm2878_vm10, %v2882_v58, %v2873_v51 }
 0x245   :  { %v2900_v13 = vadd.f32 %v399_v1, %v303_v37  ;;  %v708_v14 = vsel %vm2884_vm11, %v2875_v53, %v2888_v61  ;;  %v793_v15 = vsel %vm2884_vm11, %v2888_v61, %v2875_v53 }
 0x246   :  { %v622_v17 = vsel %vm2878_vm10, %v2868_v44, %v2890_v63  ;;  %v877_v18 = vsel %vm2878_vm10, %v2890_v63, %v2868_v44 }
 0x247   :  { %v623_v19 = vsel %vm2884_vm11, %v2871_v48, %v2900_v13 }
 0x249   :  { %v403_v21 = vpop.f32.mrb[12].mxu1 }
 0x24a   :  { %v2926_v24 = vadd.f32 %v403_v21, %v299_v34  ;;  %v405_v25 = vpop.f32.mrb[13].mxu1 }
 0x24b   :  { %v2928_v26 = vadd.f32 %v405_v25, %v303_v37  ;;  %v407_v27 = vpop.f32.mrb[14].mxu1 }
 0x24c   :  { %v2932_v38 = vadd.f32 %v407_v27, %v299_v34  ;;  %v409_v8 = vpop.f32.mrb[15].mxu1  ;;  %v537_v42 = vsel %vm2878_vm10, %v2864_v39, %v2926_v24 }
 0x24d   :  { %v2944_v50 = vadd.f32 %v409_v8, %v303_v37  ;;  %v538_v33 = vsel %vm2884_vm11, %v2866_v41, %v2928_v26 }
 0x24e   :  { %v416_v52 = vsel %vm2878_vm10, %v2930_v30, %v2932_v38 }
 0x24f   :  { %v417_v37 = vsel %vm2884_vm11, %v2942_v47, %v2944_v50 }
 0x251   :  { %v496_v55 = vpop.f32.mrb[16].mxu1 }
 0x252   :  { %v503_v56 = vadd.f32 %v496_v55, %v416_v52  ;;  %v498_v59 = vpop.f32.mrb[17].mxu1 }
 0x253   :  { %v504_v62 = vadd.f32 %v498_v59, %v417_v37  ;;  %v500_v1 = vpop.f32.mrb[18].mxu1 }
 0x254   :  { %v2125_v21 = vmul.f32 -1.442695, %v503_v56  ;;  %v501_v25 = vpop.f32.mrb[19].mxu1 }
 0x255   :  { %v2126_v34 = vmul.f32 -1.442695, %v504_v62 }
 0x256   :  { %2383 = vpow2.f32 %v2125_v21 }
 0x257   :  { %2385 = vtanh.f32 %v504_v62 }
 0x260   :  { %v2384_v27 = vpop.eup %2383 }
 0x261   :  { %v511_v8 = vadd.f32 1.0, %v2384_v27  ;;  %v2386_v31 = vpop.eup %2385 }
 0x263   :  { %2387 = vrcp.f32 %v511_v8 }
 0x264   :  { %2389 = vpow2.f32 %v2126_v34 }
 0x26d   :  { %v2388_v29 = vpop.eup %2387 }
 0x26e   :  { %v519_v36 = vmul.f32 %v2388_v29, %v2386_v31  ;;  %v2390_v54 = vpop.eup %2389  ;;  %v518_v55 = vmul.f32 0.0, %v2388_v29  ;;  %v2973_v31 = vpop.permute.xlu1 %74 }
 0x26f   :  { %v512_v52 = vadd.f32 1.0, %v2390_v54  ;;  %vm79_vm14 = vcmp.lt.s32.totalorder %v2718_v32, %v2973_v31  ;;  %vm83_vm15 = vcmp.lt.s32.totalorder %v2721_v35, %v2973_v31  ;;  %vm87_vm1 = vcmp.lt.s32.totalorder %v2731_v40, %v2973_v31 }
 0x270   :  { %521 = vrot.lane.b32.xlu0 %v519_v36, %s2577_s5  ;;  %v72_v36 = vmul.u32 7, %v2702_v23  ;;  %vm91_vm2 = vcmp.lt.s32.totalorder %v2735_v43, %v2973_v31  ;;  %vm95_vm3 = vcmp.lt.s32.totalorder %v2741_v46, %v2973_v31  ;;  %vm98_vm4 = vcmp.lt.s32.totalorder %v2747_v49, %v2973_v31 }
 0x271   :  { %2391 = vrcp.f32 %v512_v52 }
 0x272   :  { %vm2977_vm12 = vcmp.lt.s32.totalorder %v72_v36, %v2973_v31 }
 0x27b   :  { %v2392_v56 = vpop.eup %2391 }
 0x2e2   :  { %v522_v37 = vpop.permute.xlu0 %521 }
 0x2e3   :  { %v524_v59 = vadd.f32 %v522_v37, %v518_v55 }
 0x2e5   :  { %2393 = vtanh.f32 %v524_v59  ;;  %533 = vrot.lane.b32.xlu1 %v524_v59, %s2577_s5 }
 0x2ef   :  { %v2394_v1 = vpop.eup %2393 }
 0x2f0   :  { %v526_v21 = vmul.f32 %v2394_v1, %v2392_v56 }
 0x2f2   :  { %528 = vrot.lane.b32.xlu0 %v526_v21, %s2577_s5 }
 0x357   :  { %v534_v29 = vpop.permute.xlu1 %533 }
 0x358   :  { %v536_v54 = vsel %vm2977_vm12, %v534_v29, 0.0 }
 0x359   :  { %600 = vrot.lane.b32.xlu0 %v536_v54, %s2577_s5 }
 0x364   :  { %v529_v62 = vpop.permute.xlu0 %528 }
 0x365   :  { %v2986_v25 = vsel %vm2977_vm12, %v529_v62, 0.0 }
 0x366   :  { %v539_v23 = vpack.c.bf16 %v2986_v25, %v2986_v25 }
 0x368   :  { %2127 = vmatmul.mubr.msk.bf16.vlgmr.msra.gmra.mrb[8].mxu0 %vm458_vm13, %v539_v23 }
 0x369   :  { %714 = vmatpush1.bf16.msra.mxu0 %v2784_v5  ;;  %745 = vmatprep.mubr.bf16.mxu0 %v2575_v0 }
 0x36a   :  { %715 = vmatprep.subr.bf16.mxu0 %v2792_v6 }
 0x36d   :  { %716 = vmatpush1.bf16.msra.mxu0 %v2797_v7 }
 0x36e   :  { %717 = vmatprep.subr.bf16.mxu0 %v2803_v9 }
 0x371   :  { %718 = vmatpush1.bf16.msra.mxu0 %v2810_v10 }
 0x372   :  { %719 = vmatprep.subr.bf16.mxu0 %v2815_v11 }
 0x375   :  { %720 = vmatpush1.bf16.msra.mxu0 %v2822_v12 }
 0x376   :  { %883 = vmatprep.subr.bf16.mxu0 %v2779_v4 }
 0x3cb   :  { %v601_v20 = vpop.permute.xlu0 %600 }
 0x43b   :  { %v577_v27 = vpop.f32.mrb[8].mxu0 }
 0x43c   :  { %v584_v8 = vadd.f32 %v577_v27, %v537_v42  ;;  %v579_v52 = vpop.f32.mrb[9].mxu0 }
 0x43d   :  { %v585_v55 = vadd.f32 %v579_v52, %v538_v33  ;;  %v581_v37 = vpop.f32.mrb[10].mxu0 }
 0x43e   :  { %v2128_v59 = vmul.f32 -1.442695, %v584_v8  ;;  %v582_v56 = vpop.f32.mrb[11].mxu0 }
 0x43f   :  { %v2129_v23 = vmul.f32 -1.442695, %v585_v55 }
 0x440   :  { %2395 = vpow2.f32 %v2128_v59 }
 0x441   :  { %2397 = vtanh.f32 %v585_v55 }
 0x44a   :  { %v2396_v1 = vpop.eup %2395 }
 0x44b   :  { %v592_v21 = vadd.f32 1.0, %v2396_v1  ;;  %v2398_v36 = vpop.eup %2397 }
 0x44d   :  { %2399 = vrcp.f32 %v592_v21 }
 0x44e   :  { %2401 = vpow2.f32 %v2129_v23 }
 0x457   :  { %v2400_v29 = vpop.eup %2399 }
 0x458   :  { %v604_v62 = vmul.f32 %v2400_v29, %v2398_v36  ;;  %v2402_v45 = vpop.eup %2401  ;;  %v603_v27 = vmul.f32 %v2400_v29, %v601_v20 }
 0x459   :  { %v593_v42 = vadd.f32 1.0, %v2402_v45 }
 0x45a   :  { %606 = vrot.lane.b32.xlu1 %v604_v62, %s2577_s5 }
 0x45b   :  { %2403 = vrcp.f32 %v593_v42 }
 0x465   :  { %v2404_v8 = vpop.eup %2403 }
 0x4cc   :  { %v607_v33 = vpop.permute.xlu1 %606 }
 0x4cd   :  { %v609_v52 = vadd.f32 %v607_v33, %v603_v27 }
 0x4cf   :  { %2405 = vtanh.f32 %v609_v52  ;;  %618 = vrot.lane.b32.xlu1 %v609_v52, %s2577_s5 }
 0x4d9   :  { %v2406_v37 = vpop.eup %2405 }
 0x4da   :  { %v611_v59 = vmul.f32 %v2406_v37, %v2404_v8 }
 0x4dc   :  { %613 = vrot.lane.b32.xlu0 %v611_v59, %s2577_s5 }
 0x541   :  { %v619_v56 = vpop.permute.xlu1 %618 }
 0x542   :  { %v621_v45 = vsel %vm79_vm14, %v619_v56, %v536_v54 }
 0x543   :  { %685 = vrot.lane.b32.xlu0 %v621_v45, %s2577_s5 }
 0x54e   :  { %v614_v20 = vpop.permute.xlu0 %613 }
 0x54f   :  { %v3013_v55 = vsel %vm79_vm14, %v614_v20, %v2986_v25 }
 0x550   :  { %v624_v1 = vpack.c.bf16 %v3013_v55, %v3013_v55 }
 0x552   :  { %2130 = vmatmul.mubr.msk.bf16.vlgmr.msra.gmra.mrb[20].mxu1 %vm458_vm13, %v624_v1 }
 0x553   :  { %799 = vmatpush1.bf16.msra.mxu1 %v2784_v5  ;;  %830 = vmatprep.mubr.bf16.mxu1 %v2575_v0 }
 0x554   :  { %800 = vmatprep.subr.bf16.mxu1 %v2792_v6 }
 0x557   :  { %801 = vmatpush1.bf16.msra.mxu1 %v2797_v7 }
 0x558   :  { %802 = vmatprep.subr.bf16.mxu1 %v2803_v9 }
 0x55b   :  { %803 = vmatpush1.bf16.msra.mxu1 %v2810_v10 }
 0x55c   :  { %804 = vmatprep.subr.bf16.mxu1 %v2815_v11 }
 0x55f   :  { %805 = vmatpush1.bf16.msra.mxu1 %v2822_v12 }
 0x560   :  { %968 = vmatprep.subr.bf16.mxu1 %v2779_v4 }
 0x5b5   :  { %v686_v56 = vpop.permute.xlu0 %685 }
 0x625   :  { %v662_v54 = vpop.f32.mrb[20].mxu1 }
 0x626   :  { %v669_v21 = vadd.f32 %v662_v54, %v622_v17  ;;  %v664_v36 = vpop.f32.mrb[21].mxu1 }
 0x627   :  { %v670_v29 = vadd.f32 %v664_v36, %v623_v19  ;;  %v666_v62 = vpop.f32.mrb[22].mxu1 }
 0x628   :  { %v2131_v23 = vmul.f32 -1.442695, %v669_v21  ;;  %v667_v42 = vpop.f32.mrb[23].mxu1 }
 0x629   :  { %v2132_v17 = vmul.f32 -1.442695, %v670_v29 }
 0x62a   :  { %2407 = vpow2.f32 %v2131_v23 }
 0x62b   :  { %2409 = vtanh.f32 %v670_v29 }
 0x634   :  { %v2408_v27 = vpop.eup %2407 }
 0x635   :  { %v677_v33 = vadd.f32 1.0, %v2408_v27  ;;  %v2410_v52 = vpop.eup %2409 }
 0x637   :  { %2411 = vrcp.f32 %v677_v33 }
 0x638   :  { %2413 = vpow2.f32 %v2132_v17 }
 0x641   :  { %v2412_v8 = vpop.eup %2411 }
 0x642   :  { %v689_v37 = vmul.f32 %v2412_v8, %v2410_v52  ;;  %v2414_v59 = vpop.eup %2413  ;;  %v688_v1 = vmul.f32 %v2412_v8, %v686_v56 }
 0x643   :  { %v678_v20 = vadd.f32 1.0, %v2414_v59 }
 0x644   :  { %691 = vrot.lane.b32.xlu1 %v689_v37, %s2577_s5 }
 0x645   :  { %2415 = vrcp.f32 %v678_v20 }
 0x64f   :  { %v2416_v21 = vpop.eup %2415 }
 0x6b6   :  { %v692_v19 = vpop.permute.xlu1 %691 }
 0x6b7   :  { %v694_v54 = vadd.f32 %v692_v19, %v688_v1 }
 0x6b9   :  { %2417 = vtanh.f32 %v694_v54  ;;  %703 = vrot.lane.b32.xlu1 %v694_v54, %s2577_s5 }
 0x6c3   :  { %v2418_v36 = vpop.eup %2417 }
 0x6c4   :  { %v696_v62 = vmul.f32 %v2418_v36, %v2416_v21 }
 0x6c6   :  { %698 = vrot.lane.b32.xlu0 %v696_v62, %s2577_s5 }
 0x72b   :  { %v704_v23 = vpop.permute.xlu1 %703 }
 0x72c   :  { %v706_v29 = vsel %vm83_vm15, %v704_v23, %v621_v45 }
 0x72d   :  { %770 = vrot.lane.b32.xlu0 %v706_v29, %s2577_s5 }
 0x738   :  { %v699_v42 = vpop.permute.xlu0 %698 }
 0x739   :  { %v3050_v27 = vsel %vm83_vm15, %v699_v42, %v3013_v55 }
 0x73a   :  { %v709_v33 = vpack.c.bf16 %v3050_v27, %v3050_v27 }
 0x73c   :  { %2133 = vmatmul.mubr.msk.bf16.vlgmr.msra.gmra.mrb[12].mxu0 %vm458_vm13, %v709_v33 }
 0x73d   :  { %884 = vmatpush1.bf16.msra.mxu0 %v2784_v5  ;;  %915 = vmatprep.mubr.bf16.mxu0 %v2575_v0 }
 0x73e   :  { %885 = vmatprep.subr.bf16.mxu0 %v2792_v6 }
 0x741   :  { %886 = vmatpush1.bf16.msra.mxu0 %v2797_v7 }
 0x742   :  { %887 = vmatprep.subr.bf16.mxu0 %v2803_v9 }
 0x745   :  { %888 = vmatpush1.bf16.msra.mxu0 %v2810_v10 }
 0x746   :  { %889 = vmatprep.subr.bf16.mxu0 %v2815_v11 }
 0x749   :  { %890 = vmatpush1.bf16.msra.mxu0 %v2822_v12 }
 0x74a   :  { %1053 = vmatprep.subr.bf16.mxu0 %v2779_v4 }
 0x79f   :  { %v771_v36 = vpop.permute.xlu0 %770 }
 0x80f   :  { %v747_v45 = vpop.f32.mrb[12].mxu0 }
 0x810   :  { %v754_v52 = vadd.f32 %v747_v45, %v707_v2  ;;  %v749_v8 = vpop.f32.mrb[13].mxu0 }
 0x811   :  { %v755_v37 = vadd.f32 %v749_v8, %v708_v14  ;;  %v751_v17 = vpop.f32.mrb[14].mxu0 }
 0x812   :  { %v2134_v59 = vmul.f32 -1.442695, %v754_v52  ;;  %v752_v56 = vpop.f32.mrb[15].mxu0 }
 0x813   :  { %v2135_v2 = vmul.f32 -1.442695, %v755_v37 }
 0x814   :  { %2419 = vpow2.f32 %v2134_v59 }
 0x815   :  { %2421 = vtanh.f32 %v755_v37 }
 0x81e   :  { %v2420_v20 = vpop.eup %2419 }
 0x81f   :  { %v762_v4 = vadd.f32 1.0, %v2420_v20  ;;  %v2422_v1 = vpop.eup %2421 }
 0x821   :  { %2423 = vrcp.f32 %v762_v4 }
 0x822   :  { %2425 = vpow2.f32 %v2135_v2 }
 0x82b   :  { %v2424_v19 = vpop.eup %2423 }
 0x82c   :  { %v774_v54 = vmul.f32 %v2424_v19, %v2422_v1  ;;  %v2426_v21 = vpop.eup %2425  ;;  %v773_v23 = vmul.f32 %v2424_v19, %v771_v36 }
 0x82d   :  { %v763_v62 = vadd.f32 1.0, %v2426_v21 }
 0x82e   :  { %776 = vrot.lane.b32.xlu1 %v774_v54, %s2577_s5 }
 0x82f   :  { %2427 = vrcp.f32 %v763_v62 }
 0x839   :  { %v2428_v33 = vpop.eup %2427 }
 0x8a0   :  { %v777_v14 = vpop.permute.xlu1 %776 }
 0x8a1   :  { %v779_v42 = vadd.f32 %v777_v14, %v773_v23 }
 0x8a3   :  { %2429 = vtanh.f32 %v779_v42  ;;  %788 = vrot.lane.b32.xlu1 %v779_v42, %s2577_s5 }
 0x8ad   :  { %v2430_v45 = vpop.eup %2429 }
 0x8ae   :  { %v781_v52 = vmul.f32 %v2430_v45, %v2428_v33 }
 0x8b0   :  { %783 = vrot.lane.b32.xlu0 %v781_v52, %s2577_s5 }
 0x915   :  { %v789_v8 = vpop.permute.xlu1 %788 }
 0x916   :  { %v791_v37 = vsel %vm87_vm1, %v789_v8, %v706_v29 }
 0x917   :  { %855 = vrot.lane.b32.xlu0 %v791_v37, %s2577_s5 }
 0x922   :  { %v784_v17 = vpop.permute.xlu0 %783 }
 0x923   :  { %v3087_v59 = vsel %vm87_vm1, %v784_v17, %v3050_v27 }
 0x924   :  { %v794_v56 = vpack.c.bf16 %v3087_v59, %v3087_v59 }
 0x926   :  { %2136 = vmatmul.mubr.msk.bf16.vlgmr.msra.gmra.mrb[24].mxu1 %vm458_vm13, %v794_v56 }
 0x927   :  { %969 = vmatpush1.bf16.msra.mxu1 %v2784_v5  ;;  %1000 = vmatprep.mubr.bf16.mxu1 %v2575_v0 }
 0x928   :  { %970 = vmatprep.subr.bf16.mxu1 %v2792_v6 }
 0x92b   :  { %971 = vmatpush1.bf16.msra.mxu1 %v2797_v7 }
 0x92c   :  { %972 = vmatprep.subr.bf16.mxu1 %v2803_v9 }
 0x92f   :  { %973 = vmatpush1.bf16.msra.mxu1 %v2810_v10 }
 0x930   :  { %974 = vmatprep.subr.bf16.mxu1 %v2815_v11 }
 0x933   :  { %975 = vmatpush1.bf16.msra.mxu1 %v2822_v12 }
 0x9f9   :  { %v832_v29 = vpop.f32.mrb[24].mxu1 }
 0x9fa   :  { %v839_v20 = vadd.f32 %v832_v29, %v792_v3  ;;  %v834_v4 = vpop.f32.mrb[25].mxu1  ;;  %v856_v3 = vpop.permute.xlu0 %855 }
 0x9fb   :  { %v840_v1 = vadd.f32 %v834_v4, %v793_v15  ;;  %v836_v19 = vpop.f32.mrb[26].mxu1 }
 0x9fc   :  { %v2137_v54 = vmul.f32 -1.442695, %v839_v20  ;;  %v837_v2 = vpop.f32.mrb[27].mxu1 }
 0x9fd   :  { %v2138_v51 = vmul.f32 -1.442695, %v840_v1 }
 0x9fe   :  { %2431 = vpow2.f32 %v2137_v54 }
 0x9ff   :  { %2433 = vtanh.f32 %v840_v1 }
 0xa08   :  { %v2432_v21 = vpop.eup %2431 }
 0xa09   :  { %v847_v36 = vadd.f32 1.0, %v2432_v21  ;;  %v2434_v62 = vpop.eup %2433 }
 0xa0b   :  { %2435 = vrcp.f32 %v847_v36 }
 0xa0c   :  { %2437 = vpow2.f32 %v2138_v51 }
 0xa15   :  { %v2436_v23 = vpop.eup %2435 }
 0xa16   :  { %v859_v14 = vmul.f32 %v2436_v23, %v2434_v62  ;;  %v2438_v58 = vpop.eup %2437  ;;  %v858_v53 = vmul.f32 %v2436_v23, %v856_v3 }
 0xa17   :  { %v848_v42 = vadd.f32 1.0, %v2438_v58 }
 0xa18   :  { %861 = vrot.lane.b32.xlu1 %v859_v14, %s2577_s5 }
 0xa19   :  { %2439 = vrcp.f32 %v848_v42 }
 0xa23   :  { %v2440_v33 = vpop.eup %2439 }
 0xa8a   :  { %v862_v61 = vpop.permute.xlu1 %861 }
 0xa8b   :  { %v864_v15 = vadd.f32 %v862_v61, %v858_v53 }
 0xa8d   :  { %2441 = vtanh.f32 %v864_v15  ;;  %873 = vrot.lane.b32.xlu1 %v864_v15, %s2577_s5  ;;  %v3682_v15 = vsel %vm2878_vm10, %v2926_v24, %v2864_v39 }
 0xa97   :  { %v2442_v45 = vpop.eup %2441 }
 0xa98   :  { %v866_v52 = vmul.f32 %v2442_v45, %v2440_v33 }
 0xa9a   :  { %868 = vrot.lane.b32.xlu0 %v866_v52, %s2577_s5  ;;  %v3683_v52 = vsel %vm2884_vm11, %v2928_v26, %v2866_v41 }
 0xaff   :  { %v874_v8 = vpop.permute.xlu1 %873 }
 0xb00   :  { %v876_v17 = vsel %vm91_vm2, %v874_v8, %v791_v37 }
 0xb01   :  { %940 = vrot.lane.b32.xlu0 %v876_v17, %s2577_s5 }
 0xb0c   :  { %v869_v56 = vpop.permute.xlu0 %868 }
 0xb0d   :  { %v3123_v29 = vsel %vm91_vm2, %v869_v56, %v3087_v59 }
 0xb0e   :  { %v879_v20 = vpack.c.bf16 %v3123_v29, %v3123_v29 }
 0xb10   :  { %2139 = vmatmul.mubr.msk.bf16.vlgmr.msra.gmra.mrb[16].mxu0 %vm458_vm13, %v879_v20 }
 0xb11   :  { %1054 = vmatpush1.bf16.msra.mxu0 %v2784_v5  ;;  %1085 = vmatprep.mubr.bf16.mxu0 %v2575_v0 }
 0xb12   :  { %1055 = vmatprep.subr.bf16.mxu0 %v2792_v6  ;;  %v3681_v6 = vsel %vm2884_vm11, %v2900_v13, %v2871_v48 }
 0xb15   :  { %1056 = vmatpush1.bf16.msra.mxu0 %v2797_v7 }
 0xb16   :  { %1057 = vmatprep.subr.bf16.mxu0 %v2803_v9 }
 0xb19   :  { %1058 = vmatpush1.bf16.msra.mxu0 %v2810_v10 }
 0xb1a   :  { %1059 = vmatprep.subr.bf16.mxu0 %v2815_v11 }
 0xb1d   :  { %1060 = vmatpush1.bf16.msra.mxu0 %v2822_v12 }
 0xbe3   :  { %v917_v37 = vpop.f32.mrb[16].mxu0 }
 0xbe4   :  { %v924_v5 = vadd.f32 %v917_v37, %v877_v18  ;;  %v919_v4 = vpop.f32.mrb[17].mxu0  ;;  %v941_v18 = vpop.permute.xlu0 %940 }
 0xbe5   :  { %v925_v7 = vadd.f32 %v919_v4, %v3681_v6  ;;  %v921_v9 = vpop.f32.mrb[18].mxu0 }
 0xbe6   :  { %v2140_v10 = vmul.f32 -1.442695, %v924_v5  ;;  %v922_v1 = vpop.f32.mrb[19].mxu0 }
 0xbe7   :  { %v2141_v44 = vmul.f32 -1.442695, %v925_v7 }
 0xbe8   :  { %2443 = vpow2.f32 %v2140_v10 }
 0xbe9   :  { %2445 = vtanh.f32 %v925_v7 }
 0xbf2   :  { %v2444_v11 = vpop.eup %2443 }
 0xbf3   :  { %v932_v12 = vadd.f32 1.0, %v2444_v11  ;;  %v2446_v19 = vpop.eup %2445 }
 0xbf5   :  { %2447 = vrcp.f32 %v932_v12 }
 0xbf6   :  { %2449 = vpow2.f32 %v2141_v44 }
 0xbff   :  { %v2448_v54 = vpop.eup %2447 }
 0xc00   :  { %v944_v2 = vmul.f32 %v2448_v54, %v2446_v19  ;;  %v2450_v63 = vpop.eup %2449  ;;  %v943_v48 = vmul.f32 %v2448_v54, %v941_v18 }
 0xc01   :  { %v933_v21 = vadd.f32 1.0, %v2450_v63 }
 0xc02   :  { %946 = vrot.lane.b32.xlu1 %v944_v2, %s2577_s5 }
 0xc03   :  { %2451 = vrcp.f32 %v933_v21 }
 0xc0d   :  { %v2452_v62 = vpop.eup %2451 }
 0xc74   :  { %v947_v13 = vpop.permute.xlu1 %946 }
 0xc75   :  { %v949_v36 = vadd.f32 %v947_v13, %v943_v48  ;;  %v3684_v48 = vsel %vm2878_vm10, %v2932_v38, %v2930_v30  ;;  %v2359_v30 = vld [vmem:[%s3667_s6] ss:$8 sps:$4 sm:$0xff]   ;;  %v2361_v38 = vld [vmem:[%s3667_s6 + $0x4] ss:$8 sps:$4 sm:$0xff]  }
 0xc76   :  { %1219 = vmatprep.subr.bf16.mxu1 %v2361_v38 }
 0xc77   :  { %2453 = vtanh.f32 %v949_v36  ;;  %958 = vrot.lane.b32.xlu1 %v949_v36, %s2577_s5 }
 0xc81   :  { %v2454_v23 = vpop.eup %2453 }
 0xc82   :  { %v951_v14 = vmul.f32 %v2454_v23, %v2452_v62  ;;  %v3685_v62 = vsel %vm2884_vm11, %v2944_v50, %v2942_v47  ;;  %v2364_v47 = vld [vmem:[%s3667_s6 + $0x14] ss:$8 sps:$4 sm:$0xff]   ;;  %v2362_v50 = vld [vmem:[%s3667_s6 + $0x10] ss:$8 sps:$4 sm:$0xff]  }
 0xc84   :  { %953 = vrot.lane.b32.xlu0 %v951_v14, %s2577_s5 }
 0xce9   :  { %v959_v51 = vpop.permute.xlu1 %958 }
 0xcea   :  { %v961_v58 = vsel %vm95_vm3, %v959_v51, %v876_v17 }
 0xceb   :  { %1025 = vrot.lane.b32.xlu0 %v961_v58, %s2577_s5 }
 0xcf6   :  { %v954_v3 = vpop.permute.xlu0 %953 }
 0xcf7   :  { %v3159_v42 = vsel %vm95_vm3, %v954_v3, %v3123_v29 }
 0xcf8   :  { %v964_v53 = vpack.c.bf16 %v3159_v42, %v3159_v42 }
 0xcfa   :  { %2142 = vmatmul.mubr.msk.bf16.vlgmr.msra.gmra.mrb[28].mxu1 %vm458_vm13, %v964_v53 }
 0xcfb   :  { %1251 = vmatprep.mubr.bf16.mxu1 %v2575_v0  ;;  %1220 = vmatpush1.bf16.msra.mxu1 %v2359_v30 }
 0xcfc   :  { %1221 = vmatprep.subr.bf16.mxu1 %v2364_v47 }
 0xcff   :  { %1222 = vmatpush1.bf16.msra.mxu1 %v2362_v50 }
 0xd5d   :  { %v1026_v9 = vpop.permute.xlu0 %1025 }
 0xdcd   :  { %v1002_v61 = vpop.f32.mrb[28].mxu1 }
 0xdce   :  { %v1009_v33 = vadd.f32 %v1002_v61, %v3682_v15  ;;  %v1004_v45 = vpop.f32.mrb[29].mxu1 }
 0xdcf   :  { %v1010_v8 = vadd.f32 %v1004_v45, %v3683_v52  ;;  %v1006_v17 = vpop.f32.mrb[30].mxu1  ;;  %v2367_v45 = vld [vmem:[%s3667_s6 + $0x24] ss:$8 sps:$4 sm:$0xff]   ;;  %v2365_v52 = vld [vmem:[%s3667_s6 + $0x20] ss:$8 sps:$4 sm:$0xff]  }
 0xdd0   :  { %v2143_v56 = vmul.f32 -1.442695, %v1009_v33  ;;  %v1007_v20 = vpop.f32.mrb[31].mxu1  ;;  %1223 = vmatprep.subr.bf16.mxu1 %v2367_v45 }
 0xdd1   :  { %v2144_v39 = vmul.f32 -1.442695, %v1010_v8  ;;  %1224 = vmatpush1.bf16.msra.mxu1 %v2365_v52 }
 0xdd2   :  { %2455 = vpow2.f32 %v2143_v56 }
 0xdd3   :  { %2457 = vtanh.f32 %v1010_v8 }
 0xddc   :  { %v2456_v37 = vpop.eup %2455 }
 0xddd   :  { %v1017_v5 = vadd.f32 1.0, %v2456_v37  ;;  %v2458_v4 = vpop.eup %2457 }
 0xddf   :  { %2459 = vrcp.f32 %v1017_v5 }
 0xde0   :  { %2461 = vpow2.f32 %v2144_v39 }
 0xde9   :  { %v2460_v6 = vpop.eup %2459 }
 0xdea   :  { %v1029_v7 = vmul.f32 %v2460_v6, %v2458_v4  ;;  %v2462_v24 = vpop.eup %2461  ;;  %v1028_v41 = vmul.f32 %v2460_v6, %v1026_v9  ;;  %v2370_v6 = vld [vmem:[%s3667_s6 + $0x34] ss:$8 sps:$4 sm:$0xff]  }
 0xdeb   :  { %v1018_v10 = vadd.f32 1.0, %v2462_v24  ;;  %1225 = vmatprep.subr.bf16.mxu1 %v2370_v6 }
 0xdec   :  { %1031 = vrot.lane.b32.xlu1 %v1029_v7, %s2577_s5  ;;  %v2368_v7 = vld [vmem:[%s3667_s6 + $0x30] ss:$8 sps:$4 sm:$0xff]  }
 0xded   :  { %2463 = vrcp.f32 %v1018_v10  ;;  %1226 = vmatpush1.bf16.msra.mxu1 %v2368_v7  ;;  %v3233_v10 = vld [vmem:[%s3668_s7 + $0x4] ss:$8 sps:$4 sm:$0xff]  }
 0xdee   :  { %1334 = vmatprep.subr.bf16.mxu0 %v3233_v10  ;;  %1500 = vmatprep.subr.bf16.mxu1 %v3233_v10 }
 0xdf7   :  { %v2464_v11 = vpop.eup %2463 }
 0xe5e   :  { %v1032_v26 = vpop.permute.xlu1 %1031 }
 0xe5f   :  { %v1034_v1 = vadd.f32 %v1032_v26, %v1028_v41  ;;  %v3238_v41 = vld [vmem:[%s3668_s7] ss:$8 sps:$4 sm:$0xff]   ;;  %v3244_v26 = vld [vmem:[%s3668_s7 + $0x14] ss:$8 sps:$4 sm:$0xff]  }
 0xe61   :  { %2465 = vtanh.f32 %v1034_v1  ;;  %1043 = vrot.lane.b32.xlu1 %v1034_v1, %s2577_s5  ;;  %v3249_v1 = vld [vmem:[%s3668_s7 + $0x10] ss:$8 sps:$4 sm:$0xff]  }
 0xe6b   :  { %v2466_v12 = vpop.eup %2465 }
 0xe6c   :  { %v1036_v19 = vmul.f32 %v2466_v12, %v2464_v11  ;;  %v3258_v11 = vld [vmem:[%s3668_s7 + $0x24] ss:$8 sps:$4 sm:$0xff]   ;;  %v3263_v12 = vld [vmem:[%s3668_s7 + $0x20] ss:$8 sps:$4 sm:$0xff]  }
 0xe6e   :  { %1038 = vrot.lane.b32.xlu0 %v1036_v19, %s2577_s5  ;;  %v3268_v19 = vld [vmem:[%s3668_s7 + $0x34] ss:$8 sps:$4 sm:$0xff]  }
 0xed3   :  { %v1044_v54 = vpop.permute.xlu1 %1043 }
 0xed4   :  { %v1046_v2 = vsel %vm98_vm4, %v1044_v54, %v961_v58  ;;  %v3275_v54 = vld [vmem:[%s3668_s7 + $0x30] ss:$8 sps:$4 sm:$0xff]  }
 0xed5   :  { %1110 = vrot.lane.b32.xlu0 %v1046_v2, %s2577_s5  ;;  %v99_v2 = vmul.u32 7, %v2699_v22 }
 0xed7   :  { %vm3292_vm5 = vcmp.lt.s32.totalorder %v99_v2, %v2973_v31 }
 0xee0   :  { %v1039_v44 = vpop.permute.xlu0 %1038 }
 0xee1   :  { %v3188_v63 = vsel %vm98_vm4, %v1039_v44, %v3159_v42 }
 0xee2   :  { %v1049_v18 = vpack.c.bf16 %v3188_v63, %v3188_v63 }
 0xee4   :  { %2145 = vmatmul.mubr.msk.bf16.vlgmr.msra.gmra.mrb[20].mxu0 %vm458_vm13, %v1049_v18 }
 0xee5   :  { %1366 = vmatprep.mubr.bf16.mxu0 %v2575_v0  ;;  %1335 = vmatpush1.bf16.msra.mxu0 %v3238_v41 }
 0xee6   :  { %1336 = vmatprep.subr.bf16.mxu0 %v3244_v26 }
 0xee9   :  { %1337 = vmatpush1.bf16.msra.mxu0 %v3249_v1 }
 0xeea   :  { %1338 = vmatprep.subr.bf16.mxu0 %v3258_v11 }
 0xeed   :  { %1339 = vmatpush1.bf16.msra.mxu0 %v3263_v12 }
 0xeee   :  { %1340 = vmatprep.subr.bf16.mxu0 %v3268_v19 }
 0xef1   :  { %1341 = vmatpush1.bf16.msra.mxu0 %v3275_v54 }
 0xef2   :  { %1415 = vmatprep.subr.bf16.mxu0 %v3233_v10 }
 0xef4   :  { %1367 = vmatmul.mubr.bf16.vlgmr.msra.gmra.mrb[24].mxu0 %v2575_v0 }
 0xef5   :  { %1416 = vmatpush1.bf16.msra.mxu0 %v3238_v41  ;;  %1447 = vmatprep.mubr.bf16.mxu0 %v2575_v0 }
 0xef6   :  { %1417 = vmatprep.subr.bf16.mxu0 %v3244_v26 }
 0xef9   :  { %1418 = vmatpush1.bf16.msra.mxu0 %v3249_v1 }
 0xefa   :  { %1419 = vmatprep.subr.bf16.mxu0 %v3258_v11 }
 0xefd   :  { %1420 = vmatpush1.bf16.msra.mxu0 %v3263_v12 }
 0xefe   :  { %1421 = vmatprep.subr.bf16.mxu0 %v3268_v19 }
 0xf01   :  { %1422 = vmatpush1.bf16.msra.mxu0 %v3275_v54 }
 0xf02   :  { %1585 = vmatprep.subr.bf16.mxu0 %v3233_v10 }
 0xf47   :  { %v1111_v56 = vpop.permute.xlu0 %1110 }
 0xfb7   :  { %v1087_v21 = vpop.f32.mrb[20].mxu0 }
 0xfb8   :  { %v1094_v13 = vadd.f32 %v1087_v21, %v3684_v48  ;;  %v1089_v36 = vpop.f32.mrb[21].mxu0  ;;  %v1128_v48 = vsel %vm42_vm0, %v3013_v55, %v3188_v63 }
 0xfb9   :  { %v1095_v23 = vadd.f32 %v1089_v36, %v3685_v62  ;;  %v1091_v14 = vpop.f32.mrb[22].mxu0  ;;  %v1129_v36 = vsel %vm42_vm0, %v3050_v27, %v3159_v42  ;;  %v1130_v62 = vsel %vm42_vm0, %v3087_v59, %v3123_v29 }
 0xfba   :  { %v2146_v51 = vmul.f32 -1.442695, %v1094_v13  ;;  %v1092_v58 = vpop.f32.mrb[23].mxu0  ;;  %v1132_v14 = vsel %vm42_vm0, %v3159_v42, %v3050_v27  ;;  %v1133_v27 = vsel %vm42_vm0, %v3188_v63, %v3013_v55 }
 0xfbb   :  { %v2147_v8 = vmul.f32 -1.442695, %v1095_v23 }
 0xfbc   :  { %2467 = vpow2.f32 %v2146_v51  ;;  %v1131_v51 = vsel %vm42_vm0, %v3123_v29, %v3087_v59 }
 0xfbd   :  { %2469 = vtanh.f32 %v1095_v23  ;;  %v1136_v23 = vpack.c.bf16 %v1130_v62, %v1129_v36  ;;  %v1137_v58 = vpack.c.bf16 %v1132_v14, %v1131_v51 }
 0xfc6   :  { %v2468_v3 = vpop.eup %2467 }
 0xfc7   :  { %v1102_v53 = vadd.f32 1.0, %v2468_v3  ;;  %v2470_v61 = vpop.eup %2469  ;;  %v1368_v59 = vpop.f32.mrb[24].mxu0 }
 0xfc8   :  { %v1370_v29 = vpop.f32.mrb[25].mxu0 }
 0xfc9   :  { %2471 = vrcp.f32 %v1102_v53  ;;  %v1372_v53 = vpop.f32.mrb[26].mxu0 }
 0xfca   :  { %2473 = vpow2.f32 %v2147_v8 }
 0xfd3   :  { %v2472_v15 = vpop.eup %2471 }
 0xfd4   :  { %v1114_v33 = vmul.f32 %v2472_v15, %v2470_v61  ;;  %v2474_v17 = vpop.eup %2473  ;;  %v1113_v37 = vmul.f32 %v2472_v15, %v1111_v56  ;;  %v1373_v61 = vpop.f32.mrb[27].mxu0  ;;  %v1155_v15 = vld [vmem:[%s3669_s8] sm:$0x3] }
 0xfd5   :  { %v1103_v20 = vadd.f32 1.0, %v2474_v17  ;;  %v1164_v55 = vrot.slane %v1155_v15, %v3689_v16 }
 0xfd6   :  { %1116 = vrot.lane.b32.xlu1 %v1114_v33, %s2577_s5 }
 0xfd7   :  { %2475 = vrcp.f32 %v1103_v20 }
 0xfe1   :  { %v2476_v39 = vpop.eup %2475 }
0x1048   :  { %v1117_v5 = vpop.permute.xlu1 %1116 }
0x1049   :  { %v1119_v4 = vadd.f32 %v1117_v5, %v1113_v37 }
0x104b   :  { %2477 = vtanh.f32 %v1119_v4 }
0x1055   :  { %v2478_v24 = vpop.eup %2477 }
0x1056   :  { %v1121_v9 = vmul.f32 %v2478_v24, %v2476_v39 }
0x1058   :  { %1123 = vrot.lane.b32.xlu0 %v1121_v9, %s2577_s5 }
0x10ca   :  { %v1124_v18 = vpop.permute.xlu0 %1123 }
0x10cb   :  { %v1126_v21 = vsel %vm3292_vm5, %v1124_v18, %v3188_v63 }
0x10cc   :  { %v1127_v13 = vsel %vm42_vm0, %v2986_v25, %v1126_v21  ;;  %v1134_v3 = vsel %vm42_vm0, %v1126_v21, %v2986_v25  ;;  %v3688_v25 = vsub.s32 0, %v2853_v28  ;;  %vm2579_vm0 = vmmov 0  }
0x10cd   :  { %v1135_v22 = vpack.c.bf16 %v1128_v48, %v1127_v13  ;;  %v1138_v42 = vpack.c.bf16 %v1134_v3, %v1133_v27 }
0x10ce   :  { %v1160_v30 = vrot.slane %v1155_v15, %v3688_v25 }
0x10cf   :  { %2156 = vmatmul.mubr.msk.bf16.vlgmr.msra.gmra.mrb[32].mxu1 %vm458_vm13, %v1135_v22 }
0x10d0   :  { %1261 = vmatprep.mubr.bf16.mxu1 %v2575_v0  ;;  %1501 = vmatpush1.bf16.msra.mxu1 %v3238_v41 }
0x10d1   :  { %1502 = vmatprep.subr.bf16.mxu1 %v3244_v26 }
0x10d4   :  { %1503 = vmatpush1.bf16.msra.mxu1 %v3249_v1 }
0x10d5   :  { %1504 = vmatprep.subr.bf16.mxu1 %v3258_v11 }
0x10d7   :  { %2157 = vmatmul.mubr.msk.bf16.gmra.mrb[36].mxu1 %vm458_vm13, %v1136_v23 }
0x10d8   :  { %1271 = vmatprep.mubr.bf16.mxu1 %v2575_v0  ;;  %1505 = vmatpush1.bf16.msra.mxu1 %v3263_v12 }
0x10d9   :  { %1506 = vmatprep.subr.bf16.mxu1 %v3268_v19 }
0x10dc   :  { %1507 = vmatpush1.bf16.msra.mxu1 %v3275_v54 }
0x10dd   :  { %1670 = vmatprep.subr.bf16.mxu1 %v3233_v10 }
0x10df   :  { %2158 = vmatmul.mubr.msk.bf16.gmra.mrb[40].mxu1 %vm458_vm13, %v1137_v58 }
0x10e0   :  { %1281 = vmatprep.mubr.bf16.mxu1 %v2575_v0 }
0x10e7   :  { %2159 = vmatmul.mubr.msk.bf16.gmra.mrb[44].mxu1 %vm458_vm13, %v1138_v42 }
0x10e8   :  { %1532 = vmatprep.mubr.bf16.mxu1 %v2575_v0 }
0x11a2   :  { %v1253_v33 = vpop.f32.mrb[32].mxu1 }
0x11a3   :  { %v1255_v38 = vpop.f32.mrb[33].mxu1  ;;  %v3408_v53 = vadd.f32 %v1253_v33, %v1160_v30 }
0x11a4   :  { %v1257_v63 = vpop.f32.mrb[34].mxu1 }
0x11a5   :  { %v3352_v47 = vadd.f32 %v1257_v63, %v1160_v30  ;;  %v1259_v50 = vpop.f32.mrb[35].mxu1  ;;  %v3420_v63 = vadd.f32 %v1255_v38, %v1164_v55 }
0x11a6   :  { %v3354_v45 = vadd.f32 %v1259_v50, %v1164_v55 }
0x11aa   :  { %v1263_v52 = vpop.f32.mrb[36].mxu1 }
0x11ab   :  { %v3356_v8 = vadd.f32 %v1263_v52, %v1160_v30  ;;  %v1265_v17 = vpop.f32.mrb[37].mxu1 }
0x11ac   :  { %v3358_v56 = vadd.f32 %v1265_v17, %v1164_v55  ;;  %v1267_v20 = vpop.f32.mrb[38].mxu1 }
0x11ad   :  { %v3360_v37 = vadd.f32 %v1267_v20, %v1160_v30  ;;  %v1269_v5 = vpop.f32.mrb[39].mxu1 }
0x11ae   :  { %v3362_v4 = vadd.f32 %v1269_v5, %v1164_v55 }
0x11b2   :  { %v1273_v28 = vpop.f32.mrb[40].mxu1 }
0x11b3   :  { %v3364_v6 = vadd.f32 %v1273_v28, %v1160_v30  ;;  %v1275_v7 = vpop.f32.mrb[41].mxu1 }
0x11b4   :  { %v3366_v39 = vadd.f32 %v1275_v7, %v1164_v55  ;;  %v1277_v24 = vpop.f32.mrb[42].mxu1 }
0x11b5   :  { %v3368_v9 = vadd.f32 %v1277_v24, %v1160_v30  ;;  %v1279_v2 = vpop.f32.mrb[43].mxu1  ;;  %v1579_v18 = vsel %vm2878_vm10, %v3360_v37, %v3364_v6  ;;  %v1664_v21 = vsel %vm2878_vm10, %v3364_v6, %v3360_v37 }
0x11b6   :  { %v3378_v48 = vadd.f32 %v1279_v2, %v1164_v55  ;;  %v1580_v13 = vsel %vm2884_vm11, %v3362_v4, %v3366_v39  ;;  %v1665_v22 = vsel %vm2884_vm11, %v3366_v39, %v3362_v4 }
0x11b7   :  { %v1494_v36 = vsel %vm2878_vm10, %v3356_v8, %v3368_v9  ;;  %v1749_v62 = vsel %vm2878_vm10, %v3368_v9, %v3356_v8 }
0x11b8   :  { %v1495_v23 = vsel %vm2884_vm11, %v3358_v56, %v3378_v48  ;;  %v1750_v14 = vsel %vm2884_vm11, %v3378_v48, %v3358_v56 }
0x11ba   :  { %v1283_v51 = vpop.f32.mrb[44].mxu1 }
0x11bb   :  { %v3404_v58 = vadd.f32 %v1283_v51, %v1160_v30  ;;  %v1285_v3 = vpop.f32.mrb[45].mxu1 }
0x11bc   :  { %v3406_v27 = vadd.f32 %v1285_v3, %v1164_v55  ;;  %v1287_v42 = vpop.f32.mrb[46].mxu1 }
0x11bd   :  { %v3410_v61 = vadd.f32 %v1287_v42, %v1160_v30  ;;  %v1289_v15 = vpop.f32.mrb[47].mxu1  ;;  %v1409_v25 = vsel %vm2878_vm10, %v3352_v47, %v3404_v58  ;;  %v1834_v16 = vsel %vm2878_vm10, %v3404_v58, %v3352_v47 }
0x11be   :  { %v3422_v50 = vadd.f32 %v1289_v15, %v1164_v55  ;;  %v1410_v33 = vsel %vm2884_vm11, %v3354_v45, %v3406_v27 }
0x11bf   :  { %v1292_v52 = vsel %vm2878_vm10, %v3408_v53, %v3410_v61 }
0x11c0   :  { %v1375_v55 = vadd.f32 %v1368_v59, %v1292_v52  ;;  %v1293_v17 = vsel %vm2884_vm11, %v3420_v63, %v3422_v50  ;;  %v1920_v20 = vsel %vm2884_vm11, %v3422_v50, %v3420_v63  ;;  %v2001_v63 = vld [vmem:[%s3670_s9 + $0x10] sm:$0xff] }
0x11c1   :  { %v1376_v5 = vadd.f32 %v1370_v29, %v1293_v17 }
0x11c2   :  { %v2168_v28 = vmul.f32 -1.442695, %v1375_v55 }
0x11c3   :  { %v2169_v3 = vmul.f32 -1.442695, %v1376_v5 }
0x11c4   :  { %2479 = vpow2.f32 %v2168_v28 }
0x11c5   :  { %2481 = vtanh.f32 %v1376_v5 }
0x11ce   :  { %v2480_v7 = vpop.eup %2479 }
0x11cf   :  { %v1383_v24 = vadd.f32 1.0, %v2480_v7  ;;  %v2482_v2 = vpop.eup %2481 }
0x11d1   :  { %2483 = vrcp.f32 %v1383_v24 }
0x11d2   :  { %2485 = vpow2.f32 %v2169_v3 }
0x11db   :  { %v2484_v51 = vpop.eup %2483 }
0x11dc   :  { %v1391_v59 = vmul.f32 %v2484_v51, %v2482_v2  ;;  %v2486_v42 = vpop.eup %2485  ;;  %v1390_v52 = vmul.f32 0.0, %v2484_v51 }
0x11dd   :  { %v1384_v15 = vadd.f32 1.0, %v2486_v42 }
0x11de   :  { %1393 = vrot.lane.b32.xlu1 %v1391_v59, %s2577_s5 }
0x11df   :  { %2487 = vrcp.f32 %v1384_v15 }
0x11e9   :  { %v2488_v29 = vpop.eup %2487 }
0x1250   :  { %v1394_v38 = vpop.permute.xlu1 %1393 }
0x1251   :  { %v1396_v30 = vadd.f32 %v1394_v38, %v1390_v52 }
0x1253   :  { %2489 = vtanh.f32 %v1396_v30  ;;  %1405 = vrot.lane.b32.xlu1 %v1396_v30, %s2577_s5 }
0x125d   :  { %v2490_v55 = vpop.eup %2489 }
0x125e   :  { %v1398_v17 = vmul.f32 %v2490_v55, %v2488_v29 }
0x1260   :  { %1400 = vrot.lane.b32.xlu0 %v1398_v17, %s2577_s5 }
0x12c5   :  { %v1406_v28 = vpop.permute.xlu1 %1405 }
0x12c6   :  { %v1408_v7 = vsel %vm2977_vm12, %v1406_v28, 0.0 }
0x12c7   :  { %1472 = vrot.lane.b32.xlu0 %v1408_v7, %s2577_s5 }
0x12d2   :  { %v1401_v5 = vpop.permute.xlu0 %1400 }
0x12d3   :  { %v1403_v24 = vsel %vm2977_vm12, %v1401_v5, 0.0 }
0x12d4   :  { %v1411_v38 = vpack.c.bf16 %v1403_v24, %v1403_v24 }
0x12d6   :  { %2170 = vmatmul.mubr.msk.bf16.vlgmr.msra.gmra.mrb[28].mxu0 %vm458_vm13, %v1411_v38 }
0x12d7   :  { %1586 = vmatpush1.bf16.msra.mxu0 %v3238_v41  ;;  %1617 = vmatprep.mubr.bf16.mxu0 %v2575_v0 }
0x12d8   :  { %1587 = vmatprep.subr.bf16.mxu0 %v3244_v26 }
0x12db   :  { %1588 = vmatpush1.bf16.msra.mxu0 %v3249_v1 }
0x12dc   :  { %1589 = vmatprep.subr.bf16.mxu0 %v3258_v11 }
0x12df   :  { %1590 = vmatpush1.bf16.msra.mxu0 %v3263_v12 }
0x12e0   :  { %1591 = vmatprep.subr.bf16.mxu0 %v3268_v19 }
0x12e3   :  { %1592 = vmatpush1.bf16.msra.mxu0 %v3275_v54 }
0x12e4   :  { %1755 = vmatprep.subr.bf16.mxu0 %v3233_v10 }
0x1339   :  { %v1473_v38 = vpop.permute.xlu0 %1472 }
0x13a9   :  { %v1449_v34 = vpop.f32.mrb[28].mxu0 }
0x13aa   :  { %v1456_v30 = vadd.f32 %v1449_v34, %v1409_v25  ;;  %v1451_v2 = vpop.f32.mrb[29].mxu0 }
0x13ab   :  { %v1457_v51 = vadd.f32 %v1451_v2, %v1410_v33  ;;  %v1453_v59 = vpop.f32.mrb[30].mxu0 }
0x13ac   :  { %v2171_v3 = vmul.f32 -1.442695, %v1456_v30  ;;  %v1454_v42 = vpop.f32.mrb[31].mxu0 }
0x13ad   :  { %v2172_v28 = vmul.f32 -1.442695, %v1457_v51 }
0x13ae   :  { %2491 = vpow2.f32 %v2171_v3 }
0x13af   :  { %2493 = vtanh.f32 %v1457_v51 }
0x13b8   :  { %v2492_v15 = vpop.eup %2491 }
0x13b9   :  { %v1464_v52 = vadd.f32 1.0, %v2492_v15  ;;  %v2494_v29 = vpop.eup %2493 }
0x13bb   :  { %2495 = vrcp.f32 %v1464_v52 }
0x13bc   :  { %2497 = vpow2.f32 %v2172_v28 }
0x13c5   :  { %v2496_v55 = vpop.eup %2495 }
0x13c6   :  { %v1476_v17 = vmul.f32 %v2496_v55, %v2494_v29  ;;  %v2498_v5 = vpop.eup %2497  ;;  %v1475_v34 = vmul.f32 %v2496_v55, %v1473_v38 }
0x13c7   :  { %v1465_v25 = vadd.f32 1.0, %v2498_v5 }
0x13c8   :  { %1478 = vrot.lane.b32.xlu1 %v1476_v17, %s2577_s5 }
0x13c9   :  { %2499 = vrcp.f32 %v1465_v25 }
0x13d3   :  { %v2500_v30 = vpop.eup %2499 }
0x143a   :  { %v1479_v33 = vpop.permute.xlu1 %1478 }
0x143b   :  { %v1481_v2 = vadd.f32 %v1479_v33, %v1475_v34 }
0x143d   :  { %2501 = vtanh.f32 %v1481_v2  ;;  %1490 = vrot.lane.b32.xlu1 %v1481_v2, %s2577_s5 }
0x1447   :  { %v2502_v59 = vpop.eup %2501 }
0x1448   :  { %v1483_v3 = vmul.f32 %v2502_v59, %v2500_v30 }
0x144a   :  { %1485 = vrot.lane.b32.xlu0 %v1483_v3, %s2577_s5 }
0x14af   :  { %v1491_v42 = vpop.permute.xlu1 %1490 }
0x14b0   :  { %v1493_v51 = vsel %vm79_vm14, %v1491_v42, %v1408_v7 }
0x14b1   :  { %1557 = vrot.lane.b32.xlu0 %v1493_v51, %s2577_s5 }
0x14bc   :  { %v1486_v15 = vpop.permute.xlu0 %1485 }
0x14bd   :  { %v1488_v52 = vsel %vm79_vm14, %v1486_v15, %v1403_v24 }
0x14be   :  { %v1496_v29 = vpack.c.bf16 %v1488_v52, %v1488_v52 }
0x14c0   :  { %2173 = vmatmul.mubr.msk.bf16.vlgmr.msra.gmra.mrb[48].mxu1 %vm458_vm13, %v1496_v29 }
0x14c1   :  { %1671 = vmatpush1.bf16.msra.mxu1 %v3238_v41  ;;  %1702 = vmatprep.mubr.bf16.mxu1 %v2575_v0 }
0x14c2   :  { %1672 = vmatprep.subr.bf16.mxu1 %v3244_v26 }
0x14c5   :  { %1673 = vmatpush1.bf16.msra.mxu1 %v3249_v1 }
0x14c6   :  { %1674 = vmatprep.subr.bf16.mxu1 %v3258_v11 }
0x14c9   :  { %1675 = vmatpush1.bf16.msra.mxu1 %v3263_v12 }
0x14ca   :  { %1676 = vmatprep.subr.bf16.mxu1 %v3268_v19 }
0x14cd   :  { %1677 = vmatpush1.bf16.msra.mxu1 %v3275_v54 }
0x14ce   :  { %1840 = vmatprep.subr.bf16.mxu1 %v3233_v10 }
0x1523   :  { %v1558_v59 = vpop.permute.xlu0 %1557 }
0x1593   :  { %v1534_v32 = vpop.f32.mrb[48].mxu1 }
0x1594   :  { %v1541_v7 = vadd.f32 %v1534_v32, %v1494_v36  ;;  %v1536_v24 = vpop.f32.mrb[49].mxu1 }
0x1595   :  { %v1542_v55 = vadd.f32 %v1536_v24, %v1495_v23  ;;  %v1538_v17 = vpop.f32.mrb[50].mxu1 }
0x1596   :  { %v2174_v28 = vmul.f32 -1.442695, %v1541_v7  ;;  %v1539_v5 = vpop.f32.mrb[51].mxu1 }
0x1597   :  { %v2175_v36 = vmul.f32 -1.442695, %v1542_v55 }
0x1598   :  { %2503 = vpow2.f32 %v2174_v28 }
0x1599   :  { %2505 = vtanh.f32 %v1542_v55 }
0x15a2   :  { %v2504_v38 = vpop.eup %2503 }
0x15a3   :  { %v1549_v25 = vadd.f32 1.0, %v2504_v38  ;;  %v2506_v34 = vpop.eup %2505 }
0x15a5   :  { %2507 = vrcp.f32 %v1549_v25 }
0x15a6   :  { %2509 = vpow2.f32 %v2175_v36 }
0x15af   :  { %v2508_v33 = vpop.eup %2507 }
0x15b0   :  { %v1561_v2 = vmul.f32 %v2508_v33, %v2506_v34  ;;  %v2510_v30 = vpop.eup %2509  ;;  %v1560_v42 = vmul.f32 %v2508_v33, %v1558_v59 }
0x15b1   :  { %v1550_v3 = vadd.f32 1.0, %v2510_v30 }
0x15b2   :  { %1563 = vrot.lane.b32.xlu1 %v1561_v2, %s2577_s5 }
0x15b3   :  { %2511 = vrcp.f32 %v1550_v3 }
0x15bd   :  { %v2512_v29 = vpop.eup %2511 }
0x1624   :  { %v1564_v23 = vpop.permute.xlu1 %1563 }
0x1625   :  { %v1566_v15 = vadd.f32 %v1564_v23, %v1560_v42 }
0x1627   :  { %2513 = vtanh.f32 %v1566_v15  ;;  %1575 = vrot.lane.b32.xlu1 %v1566_v15, %s2577_s5 }
0x1631   :  { %v2514_v32 = vpop.eup %2513 }
0x1632   :  { %v1568_v7 = vmul.f32 %v2514_v32, %v2512_v29 }
0x1634   :  { %1570 = vrot.lane.b32.xlu0 %v1568_v7, %s2577_s5 }
0x1699   :  { %v1576_v24 = vpop.permute.xlu1 %1575 }
0x169a   :  { %v1578_v55 = vsel %vm83_vm15, %v1576_v24, %v1493_v51 }
0x169b   :  { %1642 = vrot.lane.b32.xlu0 %v1578_v55, %s2577_s5 }
0x16a6   :  { %v1571_v17 = vpop.permute.xlu0 %1570 }
0x16a7   :  { %v1573_v28 = vsel %vm83_vm15, %v1571_v17, %v1488_v52 }
0x16a8   :  { %v1581_v5 = vpack.c.bf16 %v1573_v28, %v1573_v28 }
0x16aa   :  { %2176 = vmatmul.mubr.msk.bf16.vlgmr.msra.gmra.mrb[32].mxu0 %vm458_vm13, %v1581_v5 }
0x16ab   :  { %1756 = vmatpush1.bf16.msra.mxu0 %v3238_v41  ;;  %1787 = vmatprep.mubr.bf16.mxu0 %v2575_v0 }
0x16ac   :  { %1757 = vmatprep.subr.bf16.mxu0 %v3244_v26 }
0x16af   :  { %1758 = vmatpush1.bf16.msra.mxu0 %v3249_v1 }
0x16b0   :  { %1759 = vmatprep.subr.bf16.mxu0 %v3258_v11 }
0x16b3   :  { %1760 = vmatpush1.bf16.msra.mxu0 %v3263_v12 }
0x16b4   :  { %1761 = vmatprep.subr.bf16.mxu0 %v3268_v19 }
0x16b7   :  { %1762 = vmatpush1.bf16.msra.mxu0 %v3275_v54 }
0x16b8   :  { %1925 = vmatprep.subr.bf16.mxu0 %v3233_v10 }
0x170d   :  { %v1643_v42 = vpop.permute.xlu0 %1642 }
0x177d   :  { %v1619_v35 = vpop.f32.mrb[32].mxu0 }
0x177e   :  { %v1626_v51 = vadd.f32 %v1619_v35, %v1579_v18  ;;  %v1621_v52 = vpop.f32.mrb[33].mxu0 }
0x177f   :  { %v1627_v38 = vadd.f32 %v1621_v52, %v1580_v13  ;;  %v1623_v25 = vpop.f32.mrb[34].mxu0 }
0x1780   :  { %v2177_v34 = vmul.f32 -1.442695, %v1626_v51  ;;  %v1624_v33 = vpop.f32.mrb[35].mxu0 }
0x1781   :  { %v2178_v18 = vmul.f32 -1.442695, %v1627_v38 }
0x1782   :  { %2515 = vpow2.f32 %v2177_v34 }
0x1783   :  { %2517 = vtanh.f32 %v1627_v38 }
0x178c   :  { %v2516_v2 = vpop.eup %2515 }
0x178d   :  { %v1634_v10 = vadd.f32 1.0, %v2516_v2  ;;  %v2518_v36 = vpop.eup %2517 }
0x178f   :  { %2519 = vrcp.f32 %v1634_v10 }
0x1790   :  { %2521 = vpow2.f32 %v2178_v18 }
0x1799   :  { %v2520_v30 = vpop.eup %2519 }
0x179a   :  { %v1646_v59 = vmul.f32 %v2520_v30, %v2518_v36  ;;  %v2522_v3 = vpop.eup %2521  ;;  %v1645_v15 = vmul.f32 %v2520_v30, %v1643_v42 }
0x179b   :  { %v1635_v23 = vadd.f32 1.0, %v2522_v3 }
0x179c   :  { %1648 = vrot.lane.b32.xlu1 %v1646_v59, %s2577_s5 }
0x179d   :  { %2523 = vrcp.f32 %v1635_v23 }
0x17a7   :  { %v2524_v32 = vpop.eup %2523 }
0x180e   :  { %v1649_v13 = vpop.permute.xlu1 %1648 }
0x180f   :  { %v1651_v29 = vadd.f32 %v1649_v13, %v1645_v15 }
0x1811   :  { %2525 = vtanh.f32 %v1651_v29  ;;  %1660 = vrot.lane.b32.xlu1 %v1651_v29, %s2577_s5 }
0x181b   :  { %v2526_v7 = vpop.eup %2525 }
0x181c   :  { %v1653_v24 = vmul.f32 %v2526_v7, %v2524_v32 }
0x181e   :  { %1655 = vrot.lane.b32.xlu0 %v1653_v24, %s2577_s5 }
0x1883   :  { %v1661_v17 = vpop.permute.xlu1 %1660 }
0x1884   :  { %v1663_v5 = vsel %vm87_vm1, %v1661_v17, %v1578_v55 }
0x1885   :  { %1727 = vrot.lane.b32.xlu0 %v1663_v5, %s2577_s5 }
0x1890   :  { %v1656_v35 = vpop.permute.xlu0 %1655 }
0x1891   :  { %v1658_v51 = vsel %vm87_vm1, %v1656_v35, %v1573_v28 }
0x1892   :  { %v1666_v52 = vpack.c.bf16 %v1658_v51, %v1658_v51 }
0x1894   :  { %2179 = vmatmul.mubr.msk.bf16.vlgmr.msra.gmra.mrb[52].mxu1 %vm458_vm13, %v1666_v52 }
0x1895   :  { %1841 = vmatpush1.bf16.msra.mxu1 %v3238_v41  ;;  %1872 = vmatprep.mubr.bf16.mxu1 %v2575_v0 }
0x1896   :  { %1842 = vmatprep.subr.bf16.mxu1 %v3244_v26 }
0x1899   :  { %1843 = vmatpush1.bf16.msra.mxu1 %v3249_v1 }
0x189a   :  { %1844 = vmatprep.subr.bf16.mxu1 %v3258_v11 }
0x189d   :  { %1845 = vmatpush1.bf16.msra.mxu1 %v3263_v12 }
0x189e   :  { %1846 = vmatprep.subr.bf16.mxu1 %v3268_v19 }
0x18a1   :  { %1847 = vmatpush1.bf16.msra.mxu1 %v3275_v54 }
0x1967   :  { %v1704_v40 = vpop.f32.mrb[52].mxu1 }
0x1968   :  { %v1711_v55 = vadd.f32 %v1704_v40, %v1664_v21  ;;  %v1706_v28 = vpop.f32.mrb[53].mxu1  ;;  %v1728_v21 = vpop.permute.xlu0 %1727 }
0x1969   :  { %v1712_v38 = vadd.f32 %v1706_v28, %v1665_v22  ;;  %v1708_v25 = vpop.f32.mrb[54].mxu1 }
0x196a   :  { %v2180_v34 = vmul.f32 -1.442695, %v1711_v55  ;;  %v1709_v33 = vpop.f32.mrb[55].mxu1 }
0x196b   :  { %v2181_v37 = vmul.f32 -1.442695, %v1712_v38 }
0x196c   :  { %2527 = vpow2.f32 %v2180_v34 }
0x196d   :  { %2529 = vtanh.f32 %v1712_v38 }
0x1976   :  { %v2528_v2 = vpop.eup %2527 }
0x1977   :  { %v1719_v10 = vadd.f32 1.0, %v2528_v2  ;;  %v2530_v36 = vpop.eup %2529 }
0x1979   :  { %2531 = vrcp.f32 %v1719_v10 }
0x197a   :  { %2533 = vpow2.f32 %v2181_v37 }
0x1983   :  { %v2532_v30 = vpop.eup %2531 }
0x1984   :  { %v1731_v59 = vmul.f32 %v2532_v30, %v2530_v36  ;;  %v2534_v6 = vpop.eup %2533  ;;  %v1730_v4 = vmul.f32 %v2532_v30, %v1728_v21  ;;  %v3690_v36 = vsel %vm2884_vm11, %v3406_v27, %v3354_v45 }
0x1985   :  { %v1720_v18 = vadd.f32 1.0, %v2534_v6 }
0x1986   :  { %1733 = vrot.lane.b32.xlu1 %v1731_v59, %s2577_s5 }
0x1987   :  { %2535 = vrcp.f32 %v1720_v18 }
0x1991   :  { %v2536_v3 = vpop.eup %2535 }
0x19f8   :  { %v1734_v39 = vpop.permute.xlu1 %1733 }
0x19f9   :  { %v1736_v22 = vadd.f32 %v1734_v39, %v1730_v4 }
0x19fb   :  { %2537 = vtanh.f32 %v1736_v22  ;;  %1745 = vrot.lane.b32.xlu1 %v1736_v22, %s2577_s5 }
0x1a05   :  { %v2538_v42 = vpop.eup %2537 }
0x1a06   :  { %v1738_v23 = vmul.f32 %v2538_v42, %v2536_v3 }
0x1a08   :  { %1740 = vrot.lane.b32.xlu0 %v1738_v23, %s2577_s5 }
0x1a6d   :  { %v1746_v15 = vpop.permute.xlu1 %1745 }
0x1a6e   :  { %v1748_v13 = vsel %vm91_vm2, %v1746_v15, %v1663_v5 }
0x1a6f   :  { %1812 = vrot.lane.b32.xlu0 %v1748_v13, %s2577_s5 }
0x1a7a   :  { %v1741_v29 = vpop.permute.xlu0 %1740 }
0x1a7b   :  { %v1743_v32 = vsel %vm91_vm2, %v1741_v29, %v1658_v51 }
0x1a7c   :  { %v1751_v7 = vpack.c.bf16 %v1743_v32, %v1743_v32 }
0x1a7e   :  { %2182 = vmatmul.mubr.msk.bf16.vlgmr.msra.gmra.mrb[36].mxu0 %vm458_vm13, %v1751_v7 }
0x1a7f   :  { %1926 = vmatpush1.bf16.msra.mxu0 %v3238_v41  ;;  %1957 = vmatprep.mubr.bf16.mxu0 %v2575_v0 }
0x1a80   :  { %1927 = vmatprep.subr.bf16.mxu0 %v3244_v26 }
0x1a83   :  { %1928 = vmatpush1.bf16.msra.mxu0 %v3249_v1 }
0x1a84   :  { %1929 = vmatprep.subr.bf16.mxu0 %v3258_v11 }
0x1a87   :  { %1930 = vmatpush1.bf16.msra.mxu0 %v3263_v12 }
0x1a88   :  { %1931 = vmatprep.subr.bf16.mxu0 %v3268_v19 }
0x1a8b   :  { %1932 = vmatpush1.bf16.msra.mxu0 %v3275_v54 }
0x1b51   :  { %v1789_v43 = vpop.f32.mrb[36].mxu0 }
0x1b52   :  { %v1796_v41 = vadd.f32 %v1789_v43, %v1749_v62  ;;  %v1791_v0 = vpop.f32.mrb[37].mxu0  ;;  %v1813_v62 = vpop.permute.xlu0 %1812 }
0x1b53   :  { %v1797_v26 = vadd.f32 %v1791_v0, %v1750_v14  ;;  %v1793_v1 = vpop.f32.mrb[38].mxu0  ;;  %v3691_v0 = vsel %vm2878_vm10, %v3410_v61, %v3408_v53  ;;  %v2578_v53 = vmov 0.0|0.0   ;;  %v2000_v61 = vld [vmem:[%s3670_s9 + $0x8] sm:$0xff] }
0x1b54   :  { %v2183_v11 = vmul.f32 -1.442695, %v1796_v41  ;;  %v1794_v12 = vpop.f32.mrb[39].mxu0  ;;  %2321 = vmatprep.subr.bf16.mxu1 %v2578_v53  ;;  %v2322_v50 = vpack.c.bf16 %v2000_v61, %v1999_v60 }
0x1b55   :  { %v2184_v8 = vmul.f32 -1.442695, %v1797_v26 }
0x1b56   :  { %2539 = vpow2.f32 %v2183_v11 }
0x1b57   :  { %2541 = vtanh.f32 %v1797_v26 }
0x1b60   :  { %v2540_v19 = vpop.eup %2539 }
0x1b61   :  { %v1804_v54 = vadd.f32 1.0, %v2540_v19  ;;  %v2542_v24 = vpop.eup %2541 }
0x1b63   :  { %2543 = vrcp.f32 %v1804_v54 }
0x1b64   :  { %2545 = vpow2.f32 %v2184_v8  ;;  %v2003_v8 = vld [vmem:[%s3670_s9 + $0x20] sm:$0xff] }
0x1b6d   :  { %v2544_v17 = vpop.eup %2543 }
0x1b6e   :  { %v1816_v5 = vmul.f32 %v2544_v17, %v2542_v24  ;;  %v2546_v9 = vpop.eup %2545  ;;  %v1815_v56 = vmul.f32 %v2544_v17, %v1813_v62 }
0x1b6f   :  { %v1805_v35 = vadd.f32 1.0, %v2546_v9  ;;  %v2004_v9 = vld [vmem:[%s3670_s9 + $0x28] sm:$0xff] }
0x1b70   :  { %1818 = vrot.lane.b32.xlu1 %v1816_v5, %s2577_s5  ;;  %v2328_v62 = vpack.c.bf16 %v2004_v9, %v2003_v8 }
0x1b71   :  { %2547 = vrcp.f32 %v1805_v35  ;;  %v2005_v35 = vld [vmem:[%s3670_s9 + $0x30] sm:$0xff] }
0x1b7b   :  { %v2548_v51 = vpop.eup %2547 }
0x1be2   :  { %v1819_v48 = vpop.permute.xlu1 %1818 }
0x1be3   :  { %v1821_v14 = vadd.f32 %v1819_v48, %v1815_v56  ;;  %v2006_v56 = vld [vmem:[%s3670_s9 + $0x38] sm:$0xff] }
0x1be4   :  { %v2331_v48 = vpack.c.bf16 %v2006_v56, %v2005_v35 }
0x1be5   :  { %2549 = vtanh.f32 %v1821_v14  ;;  %1830 = vrot.lane.b32.xlu1 %v1821_v14, %s2577_s5 }
0x1bef   :  { %v2550_v52 = vpop.eup %2549 }
0x1bf0   :  { %v1823_v40 = vmul.f32 %v2550_v52, %v2548_v51 }
0x1bf2   :  { %1825 = vrot.lane.b32.xlu0 %v1823_v40, %s2577_s5 }
0x1c57   :  { %v1831_v55 = vpop.permute.xlu1 %1830 }
0x1c58   :  { %v1833_v28 = vsel %vm95_vm3, %v1831_v55, %v1748_v13 }
0x1c59   :  { %1897 = vrot.lane.b32.xlu0 %v1833_v28, %s2577_s5 }
0x1c64   :  { %v1826_v38 = vpop.permute.xlu0 %1825 }
0x1c65   :  { %v1828_v25 = vsel %vm95_vm3, %v1826_v38, %v1743_v32 }
0x1c66   :  { %v1836_v34 = vpack.c.bf16 %v1828_v25, %v1828_v25 }
0x1c68   :  { %2185 = vmatmul.mubr.msk.bf16.vlgmr.msra.gmra.mrb[56].mxu1 %vm458_vm13, %v1836_v34 }
0x1c69   :  { %2323 = vmatpush3.bf16.msra.mxu1 %v2322_v50 }
0x1c6a   :  { %2324 = vmatprep.subr.bf16.mxu1 %v2578_v53 }
0x1d3b   :  { %v1874_v33 = vpop.f32.mrb[56].mxu1 }
0x1d3c   :  { %v1881_v2 = vadd.f32 %v1874_v33, %v1834_v16  ;;  %v1876_v10 = vpop.f32.mrb[57].mxu1  ;;  %v1898_v16 = vpop.permute.xlu0 %1897 }
0x1d3d   :  { %v1882_v30 = vadd.f32 %v1876_v10, %v3690_v36  ;;  %v1878_v59 = vpop.f32.mrb[58].mxu1 }
0x1d3e   :  { %v2186_v46 = vmul.f32 -1.442695, %v1881_v2  ;;  %v1879_v37 = vpop.f32.mrb[59].mxu1 }
0x1d3f   :  { %v2187_v47 = vmul.f32 -1.442695, %v1882_v30 }
0x1d40   :  { %2551 = vpow2.f32 %v2186_v46 }
0x1d41   :  { %2553 = vtanh.f32 %v1882_v30  ;;  %v2191_v30 = vld [vmem:[%s3671_s10] ss:$0 sm:$0xff] }
0x1d4a   :  { %v2552_v6 = vpop.eup %2551 }
0x1d4b   :  { %v1889_v21 = vadd.f32 1.0, %v2552_v6  ;;  %v2554_v18 = vpop.eup %2553 }
0x1d4d   :  { %2555 = vrcp.f32 %v1889_v21 }
0x1d4e   :  { %2557 = vpow2.f32 %v2187_v47 }
0x1d57   :  { %v2556_v4 = vpop.eup %2555 }
0x1d58   :  { %v1901_v39 = vmul.f32 %v2556_v4, %v2554_v18  ;;  %v2558_v58 = vpop.eup %2557  ;;  %v1900_v45 = vmul.f32 %v2556_v4, %v1898_v16 }
0x1d59   :  { %v1890_v22 = vadd.f32 1.0, %v2558_v58 }
0x1d5a   :  { %1903 = vrot.lane.b32.xlu1 %v1901_v39, %s2577_s5 }
0x1d5b   :  { %2559 = vrcp.f32 %v1890_v22 }
0x1d65   :  { %v2560_v42 = vpop.eup %2559 }
0x1dcc   :  { %v1904_v27 = vpop.permute.xlu1 %1903 }
0x1dcd   :  { %v1906_v3 = vadd.f32 %v1904_v27, %v1900_v45 }
0x1dcf   :  { %2561 = vtanh.f32 %v1906_v3  ;;  %1915 = vrot.lane.b32.xlu1 %v1906_v3, %s2577_s5 }
0x1dd9   :  { %v2562_v23 = vpop.eup %2561 }
0x1dda   :  { %v1908_v15 = vmul.f32 %v2562_v23, %v2560_v42 }
0x1ddc   :  { %1910 = vrot.lane.b32.xlu0 %v1908_v15, %s2577_s5 }
0x1e41   :  { %v1916_v13 = vpop.permute.xlu1 %1915 }
0x1e42   :  { %v1918_v29 = vsel %vm98_vm4, %v1916_v13, %v1833_v28 }
0x1e43   :  { %1982 = vrot.lane.b32.xlu0 %v1918_v29, %s2577_s5 }
0x1e4e   :  { %v1911_v32 = vpop.permute.xlu0 %1910 }
0x1e4f   :  { %v1913_v7 = vsel %vm98_vm4, %v1911_v32, %v1828_v25  ;;  %v2580_v25 = vmov 0.0  }
0x1e50   :  { %v1921_v43 = vpack.c.bf16 %v1913_v7, %v1913_v7  ;;  %2286 = vmatprep.mubr.msk.f32.mxu1 %vm2579_vm0, %v2580_v25 }
0x1e52   :  { %2188 = vmatmul.mubr.msk.bf16.vlgmr.msra.gmra.mrb[40].mxu0 %vm458_vm13, %v1921_v43 }
0x1eb5   :  { %v1983_v52 = vpop.permute.xlu0 %1982 }
0x1f25   :  { %v1959_v41 = vpop.f32.mrb[40].mxu0 }
0x1f26   :  { %v1966_v26 = vadd.f32 %v1959_v41, %v3691_v0  ;;  %v1961_v1 = vpop.f32.mrb[41].mxu0 }
0x1f27   :  { %v1967_v11 = vadd.f32 %v1961_v1, %v1920_v20  ;;  %v1963_v12 = vpop.f32.mrb[42].mxu0  ;;  %v2002_v20 = vld [vmem:[%s3670_s9 + $0x18] sm:$0xff] }
0x1f28   :  { %v2189_v49 = vmul.f32 -1.442695, %v1966_v26  ;;  %v1964_v31 = vpop.f32.mrb[43].mxu0  ;;  %v2325_v5 = vpack.c.bf16 %v2002_v20, %v2001_v63 }
0x1f29   :  { %v2190_v14 = vmul.f32 -1.442695, %v1967_v11 }
0x1f2a   :  { %2563 = vpow2.f32 %v2189_v49  ;;  %2326 = vmatpush3.bf16.msra.mxu1 %v2325_v5 }
0x1f2b   :  { %2565 = vtanh.f32 %v1967_v11  ;;  %2327 = vmatprep.subr.bf16.mxu1 %v2578_v53 }
0x1f2e   :  { %2329 = vmatpush3.bf16.msra.mxu1 %v2328_v62 }
0x1f2f   :  { %2330 = vmatprep.subr.bf16.mxu1 %v2578_v53 }
0x1f32   :  { %2332 = vmatpush3.bf16.msra.mxu1 %v2331_v48 }
0x1f34   :  { %v2564_v19 = vpop.eup %2563 }
0x1f35   :  { %v1974_v54 = vadd.f32 1.0, %v2564_v19  ;;  %v2566_v57 = vpop.eup %2565 }
0x1f37   :  { %2567 = vrcp.f32 %v1974_v54 }
0x1f38   :  { %2569 = vpow2.f32 %v2190_v14 }
0x1f41   :  { %v2568_v24 = vpop.eup %2567 }
0x1f42   :  { %v1986_v17 = vmul.f32 %v2568_v24, %v2566_v57  ;;  %v2570_v51 = vpop.eup %2569  ;;  %v1985_v55 = vmul.f32 %v2568_v24, %v1983_v52 }
0x1f43   :  { %v1975_v40 = vadd.f32 1.0, %v2570_v51 }
0x1f44   :  { %1988 = vrot.lane.b32.xlu1 %v1986_v17, %s2577_s5 }
0x1f45   :  { %2571 = vrcp.f32 %v1975_v40 }
0x1f4f   :  { %v2572_v34 = vpop.eup %2571 }
0x1fb6   :  { %v1989_v28 = vpop.permute.xlu1 %1988 }
0x1fb7   :  { %v1991_v38 = vadd.f32 %v1989_v28, %v1985_v55 }
0x1fb9   :  { %2573 = vtanh.f32 %v1991_v38 }
0x1fc3   :  { %v2574_v33 = vpop.eup %2573 }
0x1fc4   :  { %v1993_v2 = vmul.f32 %v2574_v33, %v2572_v34 }
0x1fc6   :  { %1995 = vrot.lane.b32.xlu0 %v1993_v2, %s2577_s5 }
0x2038   :  { %v1996_v10 = vpop.permute.xlu0 %1995 }
0x2039   :  { %v1998_v36 = vsel %vm3292_vm5, %v1996_v10, %v1913_v7 }
0x203a   :  { %2287 = vmatmul.mubr.msk.f32.vlgmr.msra.gmra.mrb[60].mxu1 %vm458_vm13, %v1998_v36 }
0x210d   :  { %v2083_v59 = vpop.f32.mrb[60].mxu1 }
0x210e   :  { %v2084_v46 = vadd.f32 %v2191_v30, %v2083_v59  ;;  %v2288_v37 = vpop.f32.mrb[61].mxu1 }
0x2110   :  { %2088 = vst.msk [vmem:[%s3672_s11] sm:$0xff] %vm2087_vm6, %v2084_v46 }

</bundles_post_ra>
